<compile_context>
chip_gen: v7x
topology: tpu7x:2x2x1
jax: 0.10.0
libtpu: 0.0.40
codegen_flags: <defaults>
</compile_context>

<pallas_src>
import functools

import jax
import jax.numpy as jnp
from jax.experimental import pallas as pl
from jax.experimental.pallas import tpu as pltpu


def _round_up(x, m):
    return ((x + m - 1) // m) * m


def _pad_axis(x, axis, target):
    pad = target - x.shape[axis]
    if pad <= 0:
        return x
    widths = [(0, 0)] * x.ndim
    widths[axis] = (0, pad)
    return jnp.pad(x, widths)


def tes_gnn_kernel(h_ref, a_ref, we_ref, be_ref, wl_ref, bl_ref, p_ref, wfc_ref,
                   o_ref, *, n_layers, nodes_per_graph):
    """One batch tile: bt graphs x N nodes, flattened to M = bt*N rows."""
    M, _ = h_ref.shape                     # (bt*N, in_dim) bf16, unpadded K
    Hp = we_ref.shape[1]                   # padded hidden
    bt = M // nodes_per_graph

    # ---- embedding_h: single lane-dense 2-D bf16 MXU matmul ----------------
    h = jnp.dot(h_ref[...], we_ref[...],
                preferred_element_type=jnp.float32) + be_ref[...]      # f32

    # Block-diagonal (per-tile) adjacency: one big 2-D matmul per layer
    # instead of bt tiny batched (N, N) matmuls.
    a = a_ref[0]                           # (M, M) bf16

    def sage_layer(w_self, w_neigh, bias, h):
        hb = h.astype(jnp.bfloat16)
        # mean aggregation over in-neighbors: A_norm @ H (bf16 in, f32 acc)
        c = jnp.dot(a, hb, preferred_element_type=jnp.float32)
        # node-apply Linear([h, c]) without materializing the concat buffer
        z = (jnp.dot(hb, w_self, preferred_element_type=jnp.float32)
             + jnp.dot(c.astype(jnp.bfloat16), w_neigh,
                       preferred_element_type=jnp.float32)
             + bias)
        # F.normalize(p=2): x / max(||x||,1e-12) == x * rsqrt(max(sumsq,1e-24))
        sumsq = jnp.sum(z * z, axis=-1, keepdims=True)
        z = z * jax.lax.rsqrt(jnp.maximum(sumsq, 1e-24))
        z = jnp.maximum(z, 0.0)            # ReLU
        return h + z                       # residual

    if n_layers <= 4:
        # short networks: unroll (static ref slices are free views)
        for l in range(n_layers):
            h = sage_layer(wl_ref[l, :Hp, :], wl_ref[l, Hp:, :], bl_ref[l], h)
    else:
        # deep networks: fori_loop bounds the live working set to one layer
        def body(l, h):
            w = wl_ref[l]                  # (2*Hp, Hp) bf16, dynamic layer idx
            return sage_layer(w[:Hp], w[Hp:], bl_ref[l], h)
        h = jax.lax.fori_loop(0, n_layers, body, h)

    # ---- readout + prototype similarities + FC (f32) ------------------------
    hg = jnp.mean(h.reshape(bt, nodes_per_graph, Hp), axis=1)         # (bt, Hp)
    diff = hg[:, None, :] - p_ref[...][None]                          # (bt,2P,Hp)
    dist = jnp.sum(diff * diff, axis=-1)                              # (bt, 2P)
    sim = jnp.log((dist + 1.0) / (dist + 1e-12))
    y = jnp.dot(sim, wfc_ref[...], preferred_element_type=jnp.float32)
    o_ref[...] = jax.nn.sigmoid(y)[:, None, :]                        # lane-dense


def tes_gnn_forward(h, a_norm, we, be, wl, bl, p_all, wfc, *,
                    n_layers, hidden_dim, n_classes,
                    batch_tile=None, vmem_limit_bytes=None):
    """Pads/tiles once in the wrapper, runs the batch-tiled Pallas kernel."""
    B, N, in_dim = h.shape
    L = n_layers
    P2 = p_all.shape[0]
    Hp = _round_up(hidden_dim, 128)
    OUTp = _round_up(n_classes, 128)
    # TODO(synk): if the production hidden_dim stays tiny (e.g. 32), a
    # nodes-on-lanes layout (or packing several graphs per 128-lane vreg) would
    # avoid the 32->128 padding's dead FLOPs/lanes; with hidden >= 128 the
    # current layout is already lane-dense.

    # ---- generation-aware VMEM budget (64 MiB/TC on v7x, 128 MiB v5e/v6e) ---
    try:
        vmem_capacity = int(getattr(pltpu.get_tpu_info(),
                                    "vmem_capacity_bytes", 64 * 1024 * 1024))
    except Exception:
        vmem_capacity = 64 * 1024 * 1024
    if vmem_limit_bytes is None:
        vmem_limit_bytes = int(vmem_capacity * 0.55)

    # ---- pad the (tiny) weights ONCE to lane-dense shapes. The dominant
    # streamed input h keeps its real in_dim (no 16->128 HBM inflation).
    h2d = h.reshape(B * N, in_dim).astype(jnp.bfloat16)
    we_p = _pad_axis(we, 1, Hp).astype(jnp.bfloat16)           # (in_dim, Hp)
    be_p = _pad_axis(be, 1, Hp).astype(jnp.float32)
    w_self = _pad_axis(_pad_axis(wl[:, :hidden_dim, :], 1, Hp), 2, Hp)
    w_neigh = _pad_axis(_pad_axis(wl[:, hidden_dim:, :], 1, Hp), 2, Hp)
    wl_p = jnp.concatenate([w_self, w_neigh], axis=1).astype(jnp.bfloat16)
    bl_p = _pad_axis(bl, 2, Hp).astype(jnp.float32)
    p_p = _pad_axis(p_all, 1, Hp).astype(jnp.float32)
    wfc_p = _pad_axis(wfc, 1, OUTp).astype(jnp.float32)

    # ---- VMEM-aware batch-tile picker ---------------------------------------
    def tile_bytes(bt_):
        m = bt_ * N
        weights = 2 * (in_dim * Hp * 2 + Hp * 4                # assume 2 bufs
                       + L * 2 * Hp * Hp * 2 + L * Hp * 4      # (conservative)
                       + P2 * Hp * 4 + P2 * OUTp * 4)
        blocks = (2 * m * in_dim * 2          # h tile (bf16, double-buffered)
                  + 2 * m * m * 2             # block-diag A (bf16, 2 buffers)
                  + 2 * bt_ * OUTp * 4)       # out tile (f32, 2 buffers)
        work = (m * Hp * (3 * 4 + 2 * 2)      # h/c/z f32 + hb/cb bf16 live
                + m * m * 2 + m * in_dim * 4)
        return weights + blocks + work

    if batch_tile is None:
        # block legality: sublane dim (bt*N) multiple of 16, or the full array
        divisors = [d for d in range(1, B + 1)
                    if B % d == 0 and ((d * N) % 16 == 0 or d == B)]
        fitting = [d for d in divisors if tile_bytes(d) <= vmem_limit_bytes]
        if not fitting:
            # Nothing fits the budget: smallest legal tile + most of physical
            # VMEM, instead of silently keeping bt = B.
            batch_tile = min(divisors)
            vmem_limit_bytes = int(vmem_capacity * 0.9)
        else:
            multi = [d for d in fitting if B // d >= 2]   # >=2 grid steps:
            pool = multi if multi else fitting            # pipelining + v7x TCs
            full = [d for d in pool if d * N >= 256]      # MXU M-dim fill
            batch_tile = min(full) if full else max(pool)
    bt = batch_tile
    assert B % bt == 0, (B, bt)
    assert (bt * N) % 8 == 0 or bt == B, (bt, N)
    grid = (B // bt,)
    M = bt * N

    # ---- block-diagonal adjacency per batch tile (== DGL's batched graph) ---
    # TODO(synk): for large N the (M, M) slab should be pipelined over node
    # chunks (pltpu.emit_pipeline over A row blocks) to stay inside v7x's
    # 64 MiB VMEM; at small N the bt-fold HBM blowup is negligible.
    g_steps = B // bt
    a4 = a_norm.reshape(g_steps, bt, N, N)
    eye_bt = jnp.eye(bt, dtype=a_norm.dtype)
    # bf16 A: row sums are ~1 (not exactly 1) -> within the stated tolerance;
    # keep A in f32 if accuracy ever regresses (it is not the dominant stream).
    a_bd = jnp.einsum("gbij,bc->gbicj", a4, eye_bt).reshape(
        g_steps, M, M).astype(jnp.bfloat16)

    kernel = functools.partial(tes_gnn_kernel, n_layers=n_layers,
                               nodes_per_graph=N)

    def weight_spec(shape, single_buffer):
        idx = (lambda i: (0,) * len(shape))
        if single_buffer:
            # Constant index map -> never re-DMAed; a single buffer halves the
            # VMEM these weights pin (matters most under v7x's 64 MiB/TC).
            return pl.BlockSpec(shape, idx, pipeline_mode=pl.Buffered(1))
        return pl.BlockSpec(shape, idx)

    def run(single_buffer_weights):
        in_specs = [
            pl.BlockSpec((M, in_dim), lambda i: (i, 0)),      # node features
            pl.BlockSpec((1, M, M), lambda i: (i, 0, 0)),     # block-diag A
            weight_spec((in_dim, Hp), single_buffer_weights),
            weight_spec((1, Hp), single_buffer_weights),
            weight_spec((L, 2 * Hp, Hp), single_buffer_weights),
            weight_spec((L, 1, Hp), single_buffer_weights),
            weight_spec((P2, Hp), single_buffer_weights),
            weight_spec((P2, OUTp), single_buffer_weights),
        ]
        return pl.pallas_call(
            kernel,
            out_shape=jax.ShapeDtypeStruct((B, 1, OUTp), jnp.float32),
            grid=grid,
            in_specs=in_specs,
            # (bt, 1, OUTp) block on a 3-D output: lane-dense stores and no
            # sublane restriction on bt (more legal tile choices).
            out_specs=pl.BlockSpec((bt, 1, OUTp), lambda i: (i, 0, 0)),
            compiler_params=pltpu.CompilerParams(
                dimension_semantics=("parallel",),
                vmem_limit_bytes=vmem_limit_bytes),
        )(h2d, a_bd, we_p, be_p, wl_p, bl_p, p_p, wfc_p)

    try:
        out = run(True)
    except Exception:
        # Fallback for jax builds that reject pipeline_mode=pl.Buffered(1) on
        # top-level BlockSpecs; weights then keep the default double buffer.
        out = run(False)

    return jnp.squeeze(out[:, 0, :n_classes])                 # torch .squeeze()


def tes_gnn_reference(h, a_norm, we, be, wl, bl, p_all, wfc, *,
                      n_layers, hidden_dim):
    """Pure-JAX f32 reference for correctness checking."""
    h = jnp.einsum("bnd,dk->bnk", h, we) + be[None]
    for l in range(n_layers):
        h_in = h
        c = jnp.einsum("bij,bjk->bik", a_norm, h)
        z = (jnp.einsum("bnk,kh->bnh", h, wl[l, :hidden_dim])
             + jnp.einsum("bnk,kh->bnh", c, wl[l, hidden_dim:]) + bl[l][None])
        z = z / jnp.maximum(jnp.sqrt(jnp.sum(z * z, -1, keepdims=True)), 1e-12)
        z = jnp.maximum(z, 0.0)
        h = h_in + z
    hg = jnp.mean(h, axis=1)
    dist = jnp.sum((hg[:, None, :] - p_all[None]) ** 2, axis=-1)
    sim = jnp.log((dist + 1.0) / (dist + 1e-12))
    return jnp.squeeze(jax.nn.sigmoid(sim @ wfc))


if __name__ == "__main__":
    # small shapes consistent with the module; B=16, N=8 -> a 2-step batch grid
    B, N = 16, 8                 # 16 graphs, 8 nodes each
    in_dim, hidden_dim = 16, 32
    n_layers = 2                 # net_params['L']
    num_prot_per_class = 4
    num_prototypes = 2 * num_prot_per_class
    n_classes = 1
    incorrect_strength = -0.5

    key = jax.random.PRNGKey(0)
    kh, ka, k1, k2, k3, k4, kp1, kp2 = jax.random.split(key, 8)

    # node features
    h = jax.random.normal(kh, (B, N, in_dim), dtype=jnp.float32)

    # random directed graph with self loops -> row-normalized mean-agg matrix
    adj = jax.random.bernoulli(ka, 0.3, (B, N, N)).astype(jnp.float32)
    adj = jnp.clip(adj + jnp.eye(N, dtype=jnp.float32)[None], 0.0, 1.0)
    a_norm = adj / jnp.sum(adj, axis=-1, keepdims=True)

    # embedding_h = nn.Linear(in_dim, hidden_dim)
    ke = 1.0 / (in_dim ** 0.5)
    we = jax.random.uniform(k1, (in_dim, hidden_dim), jnp.float32, -ke, ke)
    be = jax.random.uniform(k2, (1, hidden_dim), jnp.float32, -ke, ke)

    # per-layer NodeApply linear: nn.Linear(2*hidden, hidden)
    kl = 1.0 / ((2 * hidden_dim) ** 0.5)
    wl = jax.random.uniform(k3, (n_layers, 2 * hidden_dim, hidden_dim),
                            jnp.float32, -kl, kl)
    bl = jax.random.uniform(k4, (n_layers, 1, hidden_dim), jnp.float32, -kl, kl)

    # prototypes: torch.rand -> uniform [0, 1)
    p_pos = jax.random.uniform(kp1, (num_prot_per_class, hidden_dim), jnp.float32)
    p_neg = jax.random.uniform(kp2, (num_prot_per_class, hidden_dim), jnp.float32)
    p_all = jnp.concatenate([p_pos, p_neg], axis=0)            # (2P, H)

    # FC_layers weight from set_last_layer_incorrect_connection
    wfc_row = jnp.concatenate([jnp.ones((num_prot_per_class,), jnp.float32),
                               jnp.full((num_prot_per_class,), incorrect_strength,
                                        jnp.float32)])
    wfc = wfc_row.reshape(num_prototypes, n_classes)           # (2P, n_classes)

    out = tes_gnn_forward(h, a_norm, we, be, wl, bl, p_all, wfc,
                          n_layers=n_layers, hidden_dim=hidden_dim,
                          n_classes=n_classes)
    out = jax.block_until_ready(out)

    ref = tes_gnn_reference(h, a_norm, we, be, wl, bl, p_all, wfc,
                            n_layers=n_layers, hidden_dim=hidden_dim)
    assert out.shape == (B,), out.shape
    # kernel runs its matmuls in bf16 (f32 accumulation); compare with a
    # tolerance that covers bf16 input rounding on the sigmoid output.
    assert jnp.allclose(out, ref, rtol=2e-2, atol=2e-2), (out, ref)
    print("KERNEL_OK")
</pallas_src>

<mosaic_0001>
module attributes {stable_mosaic.version = 11 : i64} {
  func.func @tes_gnn_kernel(%arg0: i32, %arg1: memref<64x16xbf16, #tpu.memory_space<vmem>>, %arg2: memref<1x64x64xbf16, #tpu.memory_space<vmem>>, %arg3: memref<16x128xbf16, #tpu.memory_space<vmem>>, %arg4: memref<1x128xf32, #tpu.memory_space<vmem>>, %arg5: memref<2x256x128xbf16, #tpu.memory_space<vmem>>, %arg6: memref<2x1x128xf32, #tpu.memory_space<vmem>>, %arg7: memref<8x128xf32, #tpu.memory_space<vmem>>, %arg8: memref<8x128xf32, #tpu.memory_space<vmem>>, %arg9: memref<8x1x128xf32, #tpu.memory_space<vmem>>) attributes {dimension_semantics = [#tpu.dimension_semantics<parallel>], iteration_bounds = array<i64: 2>, scalar_prefetch = 0 : i64, scratch_operands = 0 : i64, tpu.core_type = #tpu.core_type<tc>, window_params = [{transform_indices = @transform_0, window_bounds = array<i64: 64, 16>}, {transform_indices = @transform_1, window_bounds = array<i64: 1, 64, 64>}, {pipeline_mode = #tpu.pipeline_mode<synchronous>, transform_indices = @transform_2, window_bounds = array<i64: 16, 128>}, {pipeline_mode = #tpu.pipeline_mode<synchronous>, transform_indices = @transform_3, window_bounds = array<i64: 1, 128>}, {pipeline_mode = #tpu.pipeline_mode<synchronous>, transform_indices = @transform_4, window_bounds = array<i64: 2, 256, 128>}, {pipeline_mode = #tpu.pipeline_mode<synchronous>, transform_indices = @transform_5, window_bounds = array<i64: 2, 1, 128>}, {pipeline_mode = #tpu.pipeline_mode<synchronous>, transform_indices = @transform_6, window_bounds = array<i64: 8, 128>}, {pipeline_mode = #tpu.pipeline_mode<synchronous>, transform_indices = @transform_7, window_bounds = array<i64: 8, 128>}, {transform_indices = @transform_8, window_bounds = array<i64: 8, 1, 128>}]} {
    %c0 = arith.constant 0 : index
    %c0_0 = arith.constant 0 : index
    %0 = vector.load %arg1[%c0, %c0_0] : memref<64x16xbf16, #tpu.memory_space<vmem>>, vector<64x16xbf16>
    %c0_1 = arith.constant 0 : index
    %c0_2 = arith.constant 0 : index
    %1 = vector.load %arg3[%c0_1, %c0_2] : memref<16x128xbf16, #tpu.memory_space<vmem>>, vector<16x128xbf16>
    %cst = arith.constant dense<0.000000e+00> : vector<64x128xf32>
    %2 = tpu.matmul %0, %1, %cst {dimension_numbers = #tpu.dot_dimension_numbers<[1], [0], [0], [1], [0, 0, 1, 1], [], []>} : vector<64x16xbf16>, vector<16x128xbf16>, vector<64x128xf32> -> vector<64x128xf32>
    %c0_3 = arith.constant 0 : index
    %c0_4 = arith.constant 0 : index
    %3 = vector.load %arg4[%c0_3, %c0_4] : memref<1x128xf32, #tpu.memory_space<vmem>>, vector<1x128xf32>
    %4 = vector.broadcast %3 : vector<1x128xf32> to vector<64x128xf32>
    %5 = arith.addf %2, %4 : vector<64x128xf32>
    %c0_5 = arith.constant 0 : index
    %c0_6 = arith.constant 0 : index
    %c0_7 = arith.constant 0 : index
    %6 = vector.load %arg2[%c0_5, %c0_6, %c0_7] : memref<1x64x64xbf16, #tpu.memory_space<vmem>>, vector<1x64x64xbf16>
    %7 = vector.shape_cast %6 : vector<1x64x64xbf16> to vector<64x64xbf16>
    %c0_8 = arith.constant 0 : index
    %c0_9 = arith.constant 0 : index
    %c0_10 = arith.constant 0 : index
    %8 = vector.load %arg5[%c0_8, %c0_9, %c0_10] : memref<2x256x128xbf16, #tpu.memory_space<vmem>>, vector<1x128x128xbf16>
    %9 = vector.shape_cast %8 : vector<1x128x128xbf16> to vector<128x128xbf16>
    %c0_11 = arith.constant 0 : index
    %c128 = arith.constant 128 : index
    %c0_12 = arith.constant 0 : index
    %10 = vector.load %arg5[%c0_11, %c128, %c0_12] : memref<2x256x128xbf16, #tpu.memory_space<vmem>>, vector<1x128x128xbf16>
    %11 = vector.shape_cast %10 : vector<1x128x128xbf16> to vector<128x128xbf16>
    %c0_13 = arith.constant 0 : index
    %c0_14 = arith.constant 0 : index
    %c0_15 = arith.constant 0 : index
    %12 = vector.load %arg6[%c0_13, %c0_14, %c0_15] : memref<2x1x128xf32, #tpu.memory_space<vmem>>, vector<1x1x128xf32>
    %13 = vector.shape_cast %12 : vector<1x1x128xf32> to vector<1x128xf32>
    %14 = arith.truncf %5 : vector<64x128xf32> to vector<64x128xbf16>
    %cst_16 = arith.constant dense<0.000000e+00> : vector<64x128xf32>
    %15 = tpu.matmul %7, %14, %cst_16 {dimension_numbers = #tpu.dot_dimension_numbers<[1], [0], [0], [1], [0, 0, 1, 1], [], []>} : vector<64x64xbf16>, vector<64x128xbf16>, vector<64x128xf32> -> vector<64x128xf32>
    %cst_17 = arith.constant dense<0.000000e+00> : vector<64x128xf32>
    %16 = tpu.matmul %14, %9, %cst_17 {dimension_numbers = #tpu.dot_dimension_numbers<[1], [0], [0], [1], [0, 0, 1, 1], [], []>} : vector<64x128xbf16>, vector<128x128xbf16>, vector<64x128xf32> -> vector<64x128xf32>
    %17 = arith.truncf %15 : vector<64x128xf32> to vector<64x128xbf16>
    %cst_18 = arith.constant dense<0.000000e+00> : vector<64x128xf32>
    %18 = tpu.matmul %17, %11, %cst_18 {dimension_numbers = #tpu.dot_dimension_numbers<[1], [0], [0], [1], [0, 0, 1, 1], [], []>} : vector<64x128xbf16>, vector<128x128xbf16>, vector<64x128xf32> -> vector<64x128xf32>
    %19 = arith.addf %16, %18 : vector<64x128xf32>
    %20 = vector.broadcast %13 : vector<1x128xf32> to vector<64x128xf32>
    %21 = arith.addf %19, %20 : vector<64x128xf32>
    %22 = arith.mulf %21, %21 : vector<64x128xf32>
    %cst_19 = arith.constant dense<0.000000e+00> : vector<64xf32>
    %23 = vector.multi_reduction <add>, %22, %cst_19 [1] : vector<64x128xf32> to vector<64xf32>
    %24 = vector.shape_cast %23 : vector<64xf32> to vector<64x1xf32>
    %cst_20 = arith.constant 1.000000e-24 : f32
    %25 = vector.broadcast %cst_20 : f32 to vector<64x1xf32>
    %26 = arith.maximumf %24, %25 : vector<64x1xf32>
    %27 = math.rsqrt %26 : vector<64x1xf32>
    %28 = vector.broadcast %27 : vector<64x1xf32> to vector<64x128xf32>
    %29 = arith.mulf %21, %28 : vector<64x128xf32>
    %cst_21 = arith.constant 0.000000e+00 : f32
    %30 = vector.broadcast %cst_21 : f32 to vector<64x128xf32>
    %31 = arith.maximumf %29, %30 : vector<64x128xf32>
    %32 = arith.addf %5, %31 : vector<64x128xf32>
    %c1 = arith.constant 1 : index
    %c0_22 = arith.constant 0 : index
    %c0_23 = arith.constant 0 : index
    %33 = vector.load %arg5[%c1, %c0_22, %c0_23] : memref<2x256x128xbf16, #tpu.memory_space<vmem>>, vector<1x128x128xbf16>
    %34 = vector.shape_cast %33 : vector<1x128x128xbf16> to vector<128x128xbf16>
    %c1_24 = arith.constant 1 : index
    %c128_25 = arith.constant 128 : index
    %c0_26 = arith.constant 0 : index
    %35 = vector.load %arg5[%c1_24, %c128_25, %c0_26] : memref<2x256x128xbf16, #tpu.memory_space<vmem>>, vector<1x128x128xbf16>
    %36 = vector.shape_cast %35 : vector<1x128x128xbf16> to vector<128x128xbf16>
    %c1_27 = arith.constant 1 : index
    %c0_28 = arith.constant 0 : index
    %c0_29 = arith.constant 0 : index
    %37 = vector.load %arg6[%c1_27, %c0_28, %c0_29] : memref<2x1x128xf32, #tpu.memory_space<vmem>>, vector<1x1x128xf32>
    %38 = vector.shape_cast %37 : vector<1x1x128xf32> to vector<1x128xf32>
    %39 = arith.truncf %32 : vector<64x128xf32> to vector<64x128xbf16>
    %cst_30 = arith.constant dense<0.000000e+00> : vector<64x128xf32>
    %40 = tpu.matmul %7, %39, %cst_30 {dimension_numbers = #tpu.dot_dimension_numbers<[1], [0], [0], [1], [0, 0, 1, 1], [], []>} : vector<64x64xbf16>, vector<64x128xbf16>, vector<64x128xf32> -> vector<64x128xf32>
    %cst_31 = arith.constant dense<0.000000e+00> : vector<64x128xf32>
    %41 = tpu.matmul %39, %34, %cst_31 {dimension_numbers = #tpu.dot_dimension_numbers<[1], [0], [0], [1], [0, 0, 1, 1], [], []>} : vector<64x128xbf16>, vector<128x128xbf16>, vector<64x128xf32> -> vector<64x128xf32>
    %42 = arith.truncf %40 : vector<64x128xf32> to vector<64x128xbf16>
    %cst_32 = arith.constant dense<0.000000e+00> : vector<64x128xf32>
    %43 = tpu.matmul %42, %36, %cst_32 {dimension_numbers = #tpu.dot_dimension_numbers<[1], [0], [0], [1], [0, 0, 1, 1], [], []>} : vector<64x128xbf16>, vector<128x128xbf16>, vector<64x128xf32> -> vector<64x128xf32>
    %44 = arith.addf %41, %43 : vector<64x128xf32>
    %45 = vector.broadcast %38 : vector<1x128xf32> to vector<64x128xf32>
    %46 = arith.addf %44, %45 : vector<64x128xf32>
    %47 = arith.mulf %46, %46 : vector<64x128xf32>
    %cst_33 = arith.constant dense<0.000000e+00> : vector<64xf32>
    %48 = vector.multi_reduction <add>, %47, %cst_33 [1] : vector<64x128xf32> to vector<64xf32>
    %49 = vector.shape_cast %48 : vector<64xf32> to vector<64x1xf32>
    %cst_34 = arith.constant 1.000000e-24 : f32
    %50 = vector.broadcast %cst_34 : f32 to vector<64x1xf32>
    %51 = arith.maximumf %49, %50 : vector<64x1xf32>
    %52 = math.rsqrt %51 : vector<64x1xf32>
    %53 = vector.broadcast %52 : vector<64x1xf32> to vector<64x128xf32>
    %54 = arith.mulf %46, %53 : vector<64x128xf32>
    %cst_35 = arith.constant 0.000000e+00 : f32
    %55 = vector.broadcast %cst_35 : f32 to vector<64x128xf32>
    %56 = arith.maximumf %54, %55 : vector<64x128xf32>
    %57 = arith.addf %32, %56 : vector<64x128xf32>
    %58 = vector.shape_cast %57 : vector<64x128xf32> to vector<8x8x128xf32>
    %cst_36 = arith.constant dense<0.000000e+00> : vector<8x128xf32>
    %59 = vector.multi_reduction <add>, %58, %cst_36 [1] : vector<8x8x128xf32> to vector<8x128xf32>
    %cst_37 = arith.constant 8.000000e+00 : f32
    %60 = vector.broadcast %cst_37 : f32 to vector<8x128xf32>
    %61 = arith.divf %59, %60 : vector<8x128xf32>
    %62 = vector.shape_cast %61 : vector<8x128xf32> to vector<8x1x128xf32>
    %c0_38 = arith.constant 0 : index
    %c0_39 = arith.constant 0 : index
    %63 = vector.load %arg7[%c0_38, %c0_39] : memref<8x128xf32, #tpu.memory_space<vmem>>, vector<8x128xf32>
    %64 = vector.shape_cast %63 : vector<8x128xf32> to vector<1x8x128xf32>
    %65 = vector.broadcast %62 : vector<8x1x128xf32> to vector<8x8x128xf32>
    %66 = vector.broadcast %64 : vector<1x8x128xf32> to vector<8x8x128xf32>
    %67 = arith.subf %65, %66 : vector<8x8x128xf32>
    %68 = arith.mulf %67, %67 : vector<8x8x128xf32>
    %cst_40 = arith.constant dense<0.000000e+00> : vector<8x8xf32>
    %69 = vector.multi_reduction <add>, %68, %cst_40 [2] : vector<8x8x128xf32> to vector<8x8xf32>
    %cst_41 = arith.constant 1.000000e+00 : f32
    %70 = vector.broadcast %cst_41 : f32 to vector<8x8xf32>
    %71 = arith.addf %69, %70 : vector<8x8xf32>
    %cst_42 = arith.constant 9.99999996E-13 : f32
    %72 = vector.broadcast %cst_42 : f32 to vector<8x8xf32>
    %73 = arith.addf %69, %72 : vector<8x8xf32>
    %74 = arith.divf %71, %73 : vector<8x8xf32>
    %75 = math.log %74 : vector<8x8xf32>
    %c0_43 = arith.constant 0 : index
    %c0_44 = arith.constant 0 : index
    %76 = vector.load %arg8[%c0_43, %c0_44] : memref<8x128xf32, #tpu.memory_space<vmem>>, vector<8x128xf32>
    %cst_45 = arith.constant dense<0.000000e+00> : vector<8x128xf32>
    %77 = tpu.matmul %75, %76, %cst_45 {dimension_numbers = #tpu.dot_dimension_numbers<[1], [0], [0], [1], [0, 0, 1, 1], [], []>} : vector<8x8xf32>, vector<8x128xf32>, vector<8x128xf32> -> vector<8x128xf32>
    %78 = arith.negf %77 : vector<8x128xf32>
    %79 = math.exp %78 : vector<8x128xf32>
    %cst_46 = arith.constant 1.000000e+00 : f32
    %80 = vector.broadcast %cst_46 : f32 to vector<8x128xf32>
    %81 = arith.addf %80, %79 : vector<8x128xf32>
    %82 = arith.divf %80, %81 : vector<8x128xf32>
    %83 = vector.shape_cast %82 : vector<8x128xf32> to vector<8x1x128xf32>
    %c0_47 = arith.constant 0 : index
    %c0_48 = arith.constant 0 : index
    %c0_49 = arith.constant 0 : index
    %84 = vector.load %arg9[%c0_47, %c0_48, %c0_49] : memref<8x1x128xf32, #tpu.memory_space<vmem>>, vector<8x1x128xf32>
    tpu.vector_store %arg9[%c0_47, %c0_48, %c0_49], %83 {strides = array<i32>} : memref<8x1x128xf32, #tpu.memory_space<vmem>>, vector<8x1x128xf32>,
    return
  }
  func.func @transform_0(%arg0: i32) -> (i32, i32) {
    %c0_i32 = arith.constant 0 : i32
    %c0_i32_0 = arith.constant 0 : i32
    return %arg0, %c0_i32 : i32, i32
  }
  func.func @transform_1(%arg0: i32) -> (i32, i32, i32) {
    %c0_i32 = arith.constant 0 : i32
    %c0_i32_0 = arith.constant 0 : i32
    %c0_i32_1 = arith.constant 0 : i32
    return %arg0, %c0_i32, %c0_i32_0 : i32, i32, i32
  }
  func.func @transform_2(%arg0: i32) -> (i32, i32) {
    %c0_i32 = arith.constant 0 : i32
    %c0_i32_0 = arith.constant 0 : i32
    %c0_i32_1 = arith.constant 0 : i32
    return %c0_i32, %c0_i32_0 : i32, i32
  }
  func.func @transform_3(%arg0: i32) -> (i32, i32) {
    %c0_i32 = arith.constant 0 : i32
    %c0_i32_0 = arith.constant 0 : i32
    %c0_i32_1 = arith.constant 0 : i32
    return %c0_i32, %c0_i32_0 : i32, i32
  }
  func.func @transform_4(%arg0: i32) -> (i32, i32, i32) {
    %c0_i32 = arith.constant 0 : i32
    %c0_i32_0 = arith.constant 0 : i32
    %c0_i32_1 = arith.constant 0 : i32
    %c0_i32_2 = arith.constant 0 : i32
    return %c0_i32, %c0_i32_0, %c0_i32_1 : i32, i32, i32
  }
  func.func @transform_5(%arg0: i32) -> (i32, i32, i32) {
    %c0_i32 = arith.constant 0 : i32
    %c0_i32_0 = arith.constant 0 : i32
    %c0_i32_1 = arith.constant 0 : i32
    %c0_i32_2 = arith.constant 0 : i32
    return %c0_i32, %c0_i32_0, %c0_i32_1 : i32, i32, i32
  }
  func.func @transform_6(%arg0: i32) -> (i32, i32) {
    %c0_i32 = arith.constant 0 : i32
    %c0_i32_0 = arith.constant 0 : i32
    %c0_i32_1 = arith.constant 0 : i32
    return %c0_i32, %c0_i32_0 : i32, i32
  }
  func.func @transform_7(%arg0: i32) -> (i32, i32) {
    %c0_i32 = arith.constant 0 : i32
    %c0_i32_0 = arith.constant 0 : i32
    %c0_i32_1 = arith.constant 0 : i32
    return %c0_i32, %c0_i32_0 : i32, i32
  }
  func.func @transform_8(%arg0: i32) -> (i32, i32, i32) {
    %c0_i32 = arith.constant 0 : i32
    %c0_i32_0 = arith.constant 0 : i32
    %c0_i32_1 = arith.constant 0 : i32
    return %arg0, %c0_i32, %c0_i32_0 : i32, i32, i32
  }
}

module attributes {stable_mosaic.version = 11 : i64} {
  func.func @tes_gnn_kernel(%arg0: i32, %arg1: memref<64x16xbf16, #tpu.memory_space<vmem>>, %arg2: memref<1x64x64xbf16, #tpu.memory_space<vmem>>, %arg3: memref<16x128xbf16, #tpu.memory_space<vmem>>, %arg4: memref<1x128xf32, #tpu.memory_space<vmem>>, %arg5: memref<2x256x128xbf16, #tpu.memory_space<vmem>>, %arg6: memref<2x1x128xf32, #tpu.memory_space<vmem>>, %arg7: memref<8x128xf32, #tpu.memory_space<vmem>>, %arg8: memref<8x128xf32, #tpu.memory_space<vmem>>, %arg9: memref<8x1x128xf32, #tpu.memory_space<vmem>>) attributes {dimension_semantics = [#tpu.dimension_semantics<parallel>], iteration_bounds = array<i64: 2>, scalar_prefetch = 0 : i64, scratch_operands = 0 : i64, tpu.core_type = #tpu.core_type<tc>, window_params = [{transform_indices = @transform_0, window_bounds = array<i64: 64, 16>}, {transform_indices = @transform_1, window_bounds = array<i64: 1, 64, 64>}, {pipeline_mode = #tpu.pipeline_mode<synchronous>, transform_indices = @transform_2, window_bounds = array<i64: 16, 128>}, {pipeline_mode = #tpu.pipeline_mode<synchronous>, transform_indices = @transform_3, window_bounds = array<i64: 1, 128>}, {pipeline_mode = #tpu.pipeline_mode<synchronous>, transform_indices = @transform_4, window_bounds = array<i64: 2, 256, 128>}, {pipeline_mode = #tpu.pipeline_mode<synchronous>, transform_indices = @transform_5, window_bounds = array<i64: 2, 1, 128>}, {pipeline_mode = #tpu.pipeline_mode<synchronous>, transform_indices = @transform_6, window_bounds = array<i64: 8, 128>}, {pipeline_mode = #tpu.pipeline_mode<synchronous>, transform_indices = @transform_7, window_bounds = array<i64: 8, 128>}, {transform_indices = @transform_8, window_bounds = array<i64: 8, 1, 128>}]} {
    %c0 = arith.constant 0 : index
    %c0_0 = arith.constant 0 : index
    %0 = vector.load %arg1[%c0, %c0_0] : memref<64x16xbf16, #tpu.memory_space<vmem>>, vector<64x16xbf16>
    %c0_1 = arith.constant 0 : index
    %c0_2 = arith.constant 0 : index
    %1 = vector.load %arg3[%c0_1, %c0_2] : memref<16x128xbf16, #tpu.memory_space<vmem>>, vector<16x128xbf16>
    %cst = arith.constant dense<0.000000e+00> : vector<64x128xf32>
    %2 = tpu.matmul %0, %1, %cst {dimension_numbers = #tpu.dot_dimension_numbers<[1], [0], [0], [1], [0, 0, 1, 1], [], []>} : vector<64x16xbf16>, vector<16x128xbf16>, vector<64x128xf32> -> vector<64x128xf32>
    %c0_3 = arith.constant 0 : index
    %c0_4 = arith.constant 0 : index
    %3 = vector.load %arg4[%c0_3, %c0_4] : memref<1x128xf32, #tpu.memory_space<vmem>>, vector<1x128xf32>
    %4 = vector.broadcast %3 : vector<1x128xf32> to vector<64x128xf32>
    %5 = arith.addf %2, %4 : vector<64x128xf32>
    %c0_5 = arith.constant 0 : index
    %c0_6 = arith.constant 0 : index
    %c0_7 = arith.constant 0 : index
    %6 = vector.load %arg2[%c0_5, %c0_6, %c0_7] : memref<1x64x64xbf16, #tpu.memory_space<vmem>>, vector<1x64x64xbf16>
    %7 = vector.shape_cast %6 : vector<1x64x64xbf16> to vector<64x64xbf16>
    %c0_8 = arith.constant 0 : index
    %c0_9 = arith.constant 0 : index
    %c0_10 = arith.constant 0 : index
    %8 = vector.load %arg5[%c0_8, %c0_9, %c0_10] : memref<2x256x128xbf16, #tpu.memory_space<vmem>>, vector<1x128x128xbf16>
    %9 = vector.shape_cast %8 : vector<1x128x128xbf16> to vector<128x128xbf16>
    %c0_11 = arith.constant 0 : index
    %c128 = arith.constant 128 : index
    %c0_12 = arith.constant 0 : index
    %10 = vector.load %arg5[%c0_11, %c128, %c0_12] : memref<2x256x128xbf16, #tpu.memory_space<vmem>>, vector<1x128x128xbf16>
    %11 = vector.shape_cast %10 : vector<1x128x128xbf16> to vector<128x128xbf16>
    %c0_13 = arith.constant 0 : index
    %c0_14 = arith.constant 0 : index
    %c0_15 = arith.constant 0 : index
    %12 = vector.load %arg6[%c0_13, %c0_14, %c0_15] : memref<2x1x128xf32, #tpu.memory_space<vmem>>, vector<1x1x128xf32>
    %13 = vector.shape_cast %12 : vector<1x1x128xf32> to vector<1x128xf32>
    %14 = arith.truncf %5 : vector<64x128xf32> to vector<64x128xbf16>
    %cst_16 = arith.constant dense<0.000000e+00> : vector<64x128xf32>
    %15 = tpu.matmul %7, %14, %cst_16 {dimension_numbers = #tpu.dot_dimension_numbers<[1], [0], [0], [1], [0, 0, 1, 1], [], []>} : vector<64x64xbf16>, vector<64x128xbf16>, vector<64x128xf32> -> vector<64x128xf32>
    %cst_17 = arith.constant dense<0.000000e+00> : vector<64x128xf32>
    %16 = tpu.matmul %14, %9, %cst_17 {dimension_numbers = #tpu.dot_dimension_numbers<[1], [0], [0], [1], [0, 0, 1, 1], [], []>} : vector<64x128xbf16>, vector<128x128xbf16>, vector<64x128xf32> -> vector<64x128xf32>
    %17 = arith.truncf %15 : vector<64x128xf32> to vector<64x128xbf16>
    %cst_18 = arith.constant dense<0.000000e+00> : vector<64x128xf32>
    %18 = tpu.matmul %17, %11, %cst_18 {dimension_numbers = #tpu.dot_dimension_numbers<[1], [0], [0], [1], [0, 0, 1, 1], [], []>} : vector<64x128xbf16>, vector<128x128xbf16>, vector<64x128xf32> -> vector<64x128xf32>
    %19 = arith.addf %16, %18 : vector<64x128xf32>
    %20 = vector.broadcast %13 : vector<1x128xf32> to vector<64x128xf32>
    %21 = arith.addf %19, %20 : vector<64x128xf32>
    %22 = arith.mulf %21, %21 : vector<64x128xf32>
    %cst_19 = arith.constant dense<0.000000e+00> : vector<64xf32>
    %23 = vector.multi_reduction <add>, %22, %cst_19 [1] : vector<64x128xf32> to vector<64xf32>
    %24 = vector.shape_cast %23 : vector<64xf32> to vector<64x1xf32>
    %cst_20 = arith.constant 1.000000e-24 : f32
    %25 = vector.broadcast %cst_20 : f32 to vector<64x1xf32>
    %26 = arith.maximumf %24, %25 : vector<64x1xf32>
    %27 = math.rsqrt %26 : vector<64x1xf32>
    %28 = vector.broadcast %27 : vector<64x1xf32> to vector<64x128xf32>
    %29 = arith.mulf %21, %28 : vector<64x128xf32>
    %cst_21 = arith.constant 0.000000e+00 : f32
    %30 = vector.broadcast %cst_21 : f32 to vector<64x128xf32>
    %31 = arith.maximumf %29, %30 : vector<64x128xf32>
    %32 = arith.addf %5, %31 : vector<64x128xf32>
    %c1 = arith.constant 1 : index
    %c0_22 = arith.constant 0 : index
    %c0_23 = arith.constant 0 : index
    %33 = vector.load %arg5[%c1, %c0_22, %c0_23] : memref<2x256x128xbf16, #tpu.memory_space<vmem>>, vector<1x128x128xbf16>
    %34 = vector.shape_cast %33 : vector<1x128x128xbf16> to vector<128x128xbf16>
    %c1_24 = arith.constant 1 : index
    %c128_25 = arith.constant 128 : index
    %c0_26 = arith.constant 0 : index
    %35 = vector.load %arg5[%c1_24, %c128_25, %c0_26] : memref<2x256x128xbf16, #tpu.memory_space<vmem>>, vector<1x128x128xbf16>
    %36 = vector.shape_cast %35 : vector<1x128x128xbf16> to vector<128x128xbf16>
    %c1_27 = arith.constant 1 : index
    %c0_28 = arith.constant 0 : index
    %c0_29 = arith.constant 0 : index
    %37 = vector.load %arg6[%c1_27, %c0_28, %c0_29] : memref<2x1x128xf32, #tpu.memory_space<vmem>>, vector<1x1x128xf32>
    %38 = vector.shape_cast %37 : vector<1x1x128xf32> to vector<1x128xf32>
    %39 = arith.truncf %32 : vector<64x128xf32> to vector<64x128xbf16>
    %cst_30 = arith.constant dense<0.000000e+00> : vector<64x128xf32>
    %40 = tpu.matmul %7, %39, %cst_30 {dimension_numbers = #tpu.dot_dimension_numbers<[1], [0], [0], [1], [0, 0, 1, 1], [], []>} : vector<64x64xbf16>, vector<64x128xbf16>, vector<64x128xf32> -> vector<64x128xf32>
    %cst_31 = arith.constant dense<0.000000e+00> : vector<64x128xf32>
    %41 = tpu.matmul %39, %34, %cst_31 {dimension_numbers = #tpu.dot_dimension_numbers<[1], [0], [0], [1], [0, 0, 1, 1], [], []>} : vector<64x128xbf16>, vector<128x128xbf16>, vector<64x128xf32> -> vector<64x128xf32>
    %42 = arith.truncf %40 : vector<64x128xf32> to vector<64x128xbf16>
    %cst_32 = arith.constant dense<0.000000e+00> : vector<64x128xf32>
    %43 = tpu.matmul %42, %36, %cst_32 {dimension_numbers = #tpu.dot_dimension_numbers<[1], [0], [0], [1], [0, 0, 1, 1], [], []>} : vector<64x128xbf16>, vector<128x128xbf16>, vector<64x128xf32> -> vector<64x128xf32>
    %44 = arith.addf %41, %43 : vector<64x128xf32>
    %45 = vector.broadcast %38 : vector<1x128xf32> to vector<64x128xf32>
    %46 = arith.addf %44, %45 : vector<64x128xf32>
    %47 = arith.mulf %46, %46 : vector<64x128xf32>
    %cst_33 = arith.constant dense<0.000000e+00> : vector<64xf32>
    %48 = vector.multi_reduction <add>, %47, %cst_33 [1] : vector<64x128xf32> to vector<64xf32>
    %49 = vector.shape_cast %48 : vector<64xf32> to vector<64x1xf32>
    %cst_34 = arith.constant 1.000000e-24 : f32
    %50 = vector.broadcast %cst_34 : f32 to vector<64x1xf32>
    %51 = arith.maximumf %49, %50 : vector<64x1xf32>
    %52 = math.rsqrt %51 : vector<64x1xf32>
    %53 = vector.broadcast %52 : vector<64x1xf32> to vector<64x128xf32>
    %54 = arith.mulf %46, %53 : vector<64x128xf32>
    %cst_35 = arith.constant 0.000000e+00 : f32
    %55 = vector.broadcast %cst_35 : f32 to vector<64x128xf32>
    %56 = arith.maximumf %54, %55 : vector<64x128xf32>
    %57 = arith.addf %32, %56 : vector<64x128xf32>
    %58 = vector.shape_cast %57 : vector<64x128xf32> to vector<8x8x128xf32>
    %cst_36 = arith.constant dense<0.000000e+00> : vector<8x128xf32>
    %59 = vector.multi_reduction <add>, %58, %cst_36 [1] : vector<8x8x128xf32> to vector<8x128xf32>
    %cst_37 = arith.constant 8.000000e+00 : f32
    %60 = vector.broadcast %cst_37 : f32 to vector<8x128xf32>
    %61 = arith.divf %59, %60 : vector<8x128xf32>
    %62 = vector.shape_cast %61 : vector<8x128xf32> to vector<8x1x128xf32>
    %c0_38 = arith.constant 0 : index
    %c0_39 = arith.constant 0 : index
    %63 = vector.load %arg7[%c0_38, %c0_39] : memref<8x128xf32, #tpu.memory_space<vmem>>, vector<8x128xf32>
    %64 = vector.shape_cast %63 : vector<8x128xf32> to vector<1x8x128xf32>
    %65 = vector.broadcast %62 : vector<8x1x128xf32> to vector<8x8x128xf32>
    %66 = vector.broadcast %64 : vector<1x8x128xf32> to vector<8x8x128xf32>
    %67 = arith.subf %65, %66 : vector<8x8x128xf32>
    %68 = arith.mulf %67, %67 : vector<8x8x128xf32>
    %cst_40 = arith.constant dense<0.000000e+00> : vector<8x8xf32>
    %69 = vector.multi_reduction <add>, %68, %cst_40 [2] : vector<8x8x128xf32> to vector<8x8xf32>
    %cst_41 = arith.constant 1.000000e+00 : f32
    %70 = vector.broadcast %cst_41 : f32 to vector<8x8xf32>
    %71 = arith.addf %69, %70 : vector<8x8xf32>
    %cst_42 = arith.constant 9.99999996E-13 : f32
    %72 = vector.broadcast %cst_42 : f32 to vector<8x8xf32>
    %73 = arith.addf %69, %72 : vector<8x8xf32>
    %74 = arith.divf %71, %73 : vector<8x8xf32>
    %75 = math.log %74 : vector<8x8xf32>
    %c0_43 = arith.constant 0 : index
    %c0_44 = arith.constant 0 : index
    %76 = vector.load %arg8[%c0_43, %c0_44] : memref<8x128xf32, #tpu.memory_space<vmem>>, vector<8x128xf32>
    %cst_45 = arith.constant dense<0.000000e+00> : vector<8x128xf32>
    %77 = tpu.matmul %75, %76, %cst_45 {dimension_numbers = #tpu.dot_dimension_numbers<[1], [0], [0], [1], [0, 0, 1, 1], [], []>} : vector<8x8xf32>, vector<8x128xf32>, vector<8x128xf32> -> vector<8x128xf32>
    %78 = arith.negf %77 : vector<8x128xf32>
    %79 = math.exp %78 : vector<8x128xf32>
    %cst_46 = arith.constant 1.000000e+00 : f32
    %80 = vector.broadcast %cst_46 : f32 to vector<8x128xf32>
    %81 = arith.addf %80, %79 : vector<8x128xf32>
    %82 = arith.divf %80, %81 : vector<8x128xf32>
    %83 = vector.shape_cast %82 : vector<8x128xf32> to vector<8x1x128xf32>
    %c0_47 = arith.constant 0 : index
    %c0_48 = arith.constant 0 : index
    %c0_49 = arith.constant 0 : index
    %84 = vector.load %arg9[%c0_47, %c0_48, %c0_49] : memref<8x1x128xf32, #tpu.memory_space<vmem>>, vector<8x1x128xf32>
    tpu.vector_store %arg9[%c0_47, %c0_48, %c0_49], %83 {strides = array<i32>} : memref<8x1x128xf32, #tpu.memory_space<vmem>>, vector<8x1x128xf32>,
    return
  }
  func.func @transform_0(%arg0: i32) -> (i32, i32) {
    %c0_i32 = arith.constant 0 : i32
    %c0_i32_0 = arith.constant 0 : i32
    return %arg0, %c0_i32 : i32, i32
  }
  func.func @transform_1(%arg0: i32) -> (i32, i32, i32) {
    %c0_i32 = arith.constant 0 : i32
    %c0_i32_0 = arith.constant 0 : i32
    %c0_i32_1 = arith.constant 0 : i32
    return %arg0, %c0_i32, %c0_i32_0 : i32, i32, i32
  }
  func.func @transform_2(%arg0: i32) -> (i32, i32) {
    %c0_i32 = arith.constant 0 : i32
    %c0_i32_0 = arith.constant 0 : i32
    %c0_i32_1 = arith.constant 0 : i32
    return %c0_i32, %c0_i32_0 : i32, i32
  }
  func.func @transform_3(%arg0: i32) -> (i32, i32) {
    %c0_i32 = arith.constant 0 : i32
    %c0_i32_0 = arith.constant 0 : i32
    %c0_i32_1 = arith.constant 0 : i32
    return %c0_i32, %c0_i32_0 : i32, i32
  }
  func.func @transform_4(%arg0: i32) -> (i32, i32, i32) {
    %c0_i32 = arith.constant 0 : i32
    %c0_i32_0 = arith.constant 0 : i32
    %c0_i32_1 = arith.constant 0 : i32
    %c0_i32_2 = arith.constant 0 : i32
    return %c0_i32, %c0_i32_0, %c0_i32_1 : i32, i32, i32
  }
  func.func @transform_5(%arg0: i32) -> (i32, i32, i32) {
    %c0_i32 = arith.constant 0 : i32
    %c0_i32_0 = arith.constant 0 : i32
    %c0_i32_1 = arith.constant 0 : i32
    %c0_i32_2 = arith.constant 0 : i32
    return %c0_i32, %c0_i32_0, %c0_i32_1 : i32, i32, i32
  }
  func.func @transform_6(%arg0: i32) -> (i32, i32) {
    %c0_i32 = arith.constant 0 : i32
    %c0_i32_0 = arith.constant 0 : i32
    %c0_i32_1 = arith.constant 0 : i32
    return %c0_i32, %c0_i32_0 : i32, i32
  }
  func.func @transform_7(%arg0: i32) -> (i32, i32) {
    %c0_i32 = arith.constant 0 : i32
    %c0_i32_0 = arith.constant 0 : i32
    %c0_i32_1 = arith.constant 0 : i32
    return %c0_i32, %c0_i32_0 : i32, i32
  }
  func.func @transform_8(%arg0: i32) -> (i32, i32, i32) {
    %c0_i32 = arith.constant 0 : i32
    %c0_i32_0 = arith.constant 0 : i32
    %c0_i32_1 = arith.constant 0 : i32
    return %arg0, %c0_i32, %c0_i32_0 : i32, i32, i32
  }
}

</mosaic_0001>

<bundles_post_ra>
// kernel: tpu_custom_call.1
= control target key start
LH: loop header
LB: loop body
LE: loop exit
PB: predicated region body
PF: predicated region fallthrough
CT: control target
= control target key end

     0   :  { %13 = vsyncpa [#allocation3], 0  ;;  %s2805_s0 = inlined_call_operand.vmem [shape: bf16[128,16], index: 0, kind: input, shape index: {}]   ;;  %s2806_s1 = inlined_call_operand.vmem [shape: bf16[2,64,64], index: 1, kind: input, shape index: {}]   ;;  %s2807_s2 = inlined_call_operand.vmem [shape: bf16[16,128], index: 2, kind: input, shape index: {}]   ;;  %s2808_s3 = inlined_call_operand.hbm [shape: f32[1,128], index: 3, kind: input, shape index: {}]   ;;  %s2809_s4 = inlined_call_operand.hbm [shape: bf16[2,256,128], index: 4, kind: input, shape index: {}]   ;;  %s2810_s5 = inlined_call_operand.vmem [shape: f32[2,1,128], index: 5, kind: input, shape index: {}]   ;;  %s2811_s6 = inlined_call_operand.vmem [shape: f32[8,128], index: 6, kind: input, shape index: {}]   ;;  %s2812_s7 = inlined_call_operand.vmem [shape: f32[8,128], index: 7, kind: input, shape index: {}]   ;;  %s2813_s8 = inlined_call_operand.hbm [shape: f32[16,1,128], index: 8, kind: output, shape index: {}]  }
   0x1   :  { %14 = vsyncpa [#allocation6], 0 }
   0x2   :  { %15 = vsyncpa [#allocation4], 0 }
   0x3   :  { %17 = vsyncpa [#allocation4 + $0x1], 0  ;;  %s2462_s27 = smov 0   ;;  %s2464_s28 = smov 0  }
   0x4   :  { %s2466_s29 = smov 0   ;;  %s2468_s30 = smov 0  }
   0x5 LB: > { %s2483_s9 = sadd.s32 4294967295, %s2405_s30   ;;  %s1790_s10 = sadd.s32 4294967294, %s2405_s30   ;;  %s2405_s30 = sphi %s2468_s30, %s2831_s30   ;;  %s2401_s29 = sphi %s2466_s29, %s2830_s29   ;;  %s2397_s28 = sphi %s2464_s28, %s2829_s28   ;;  %s2393_s27 = sphi %s2462_s27, %s2828_s27  }
   0x6   : > { %s2487_s11 = sadd.s32 1, %s2405_s30   ;;  %s208_s12 = sadd.s32 1, %s2401_s29 }
   0x7   : > { %s205_s13 = ssub.s32 %s2405_s30, %s2487_s11  ;;  %p218_p0 = scmp.ne.s32.totalorder %s2401_s29, %s2397_s28 }
   0x8   : > { %p206_p1 = scmp.eq.s32.totalorder %s205_s13, 0  ;;  %p219_p2 = scmp.eq.s32.totalorder %s2483_s9, 1 }
   0x9   : > { %p224_p3 = scmp.ne.s32.totalorder %s2397_s28, %s2393_s27  ;;  %p225_p4 = scmp.eq.s32.totalorder %s1790_s10, 1 }
   0xa   : > { %s2498_s14 = scalar_select %p206_p1, %s2401_s29, %s208_s12  }
   0xb   : > { %p2500_p5 = por %p219_p2, %p218_p0  ;;  %p2504_p6 = por %p225_p4, %p224_p3 }
   0xc   : > { %p1791_p7 = scmp.ge.s32.totalorder %s2405_s30, 1  ;;  %p232_p8 = scmp.lt.s32.totalorder %s2405_s30, 3 }
   0xd   : > { %s2817_s15 = scalar_select %p2500_p5, 1, 0 }
   0xe   : > { %s2818_s16 = scalar_select %p2504_p6, 1, 0 }
   0xf   : > { %p2814_p9 = scmp.eq.s32.totalorder %s2483_s9, 0  ;;  %p2511_p10 = pnand %p1791_p7, %p232_p8 }
  0x10   : > { %s2407_s18 = smov [#allocation2]   ;;  %s2408_s20 = smov [#allocation5]  }
  0x11   : > { %s2819_s17 = scalar_select %p2511_p10, 1, 0 }
  0x12   : > { %s248_s19 = sshll.u32 %s2407_s18, 4  ;;  %p2113_p11 = pneg %p2511_p10  ;;  %s249_s19 = int_to_ptr.vmem [resolvable:$true] %s248_s19 }
  0x13   : > { %s258_s21 = sshll.u32 %s2408_s20, 4  ;;  %s2279_s25 = scalar_lea.hbm %s2808_s3, 16  ;;  %s2523_s21 = int_to_ptr.vmem [resolvable:$true] %s258_s21 }
  0x14   : > { %p2519_p12 = pnand %p2814_p9, %p2113_p11  ;;  %p2280_p13 = scmp.ne.s32.totalorder %s2808_s3, %s2279_s25 }
  0x15   : > { %p2286_p3 = scmp.lt.u32.totalorder %s2279_s25, %s2808_s3 }
  0x16   : > { %p2281_p0 = pneg %p2519_p12 }
  0x18   : > { %p2282_p1 = pnand %p2281_p0, %p2280_p13 }
  0x1a   : > { %p2283_p2 = pneg %p2282_p1 }
  0x1c   : > { %p2288_p4 = pnand %p2286_p3, %p2283_p2 }
  0x1e   : > { %2291 = shalt.err (!%p2288_p4)
}
  0x1f   : > { %s2292_s18 = scalar_lea.vmem %s249_s19, 16  ;;  %s2299_s20 = scalar_lea.vmem %s249_s19, 32 }
  0x20   : > { %p2293_p7 = scmp.ne.s32.totalorder %s249_s19, %s2292_s18  ;;  %p2300_p9 = scmp.lt.s32.totalorder %s249_s19, %s249_s19 }
  0x21   : > { %p2301_p6 = scmp.lt.s32.totalorder %s2299_s20, %s2292_s18 }
  0x22   : > { %p2295_p8 = pnand %p2293_p7, %p2281_p0 }
  0x23   : > { %p2302_p5 = por %p2301_p6, %p2300_p9 }
  0x24   : > { %p2296_p11 = pneg %p2295_p8 }
  0x26   : > { %p2303_p10 = pnand %p2302_p5, %p2296_p11 }
  0x28   : > { %2306 = shalt.err (!%p2303_p10)
}
  0x29   : > { %2116 = dma.hbm_to_vmem [thread:$0]  (!%p2519_p12), %s2808_s3, 16, %s249_s19, [#allocation3]  }
  0x2a   : > { %s2307_s10 = scalar_lea.hbm %s2809_s4, 4096 }
  0x2b   : > { %p2308_p13 = scmp.ne.s32.totalorder %s2809_s4, %s2307_s10  ;;  %p2314_p9 = scmp.lt.u32.totalorder %s2307_s10, %s2809_s4 }
  0x2d   : > { %p2310_p6 = pnand %p2308_p13, %p2281_p0 }
  0x2f   : > { %p2311_p5 = pneg %p2310_p6 }
  0x31   : > { %p2316_p10 = pnand %p2314_p9, %p2311_p5 }
  0x33   : > { %2319 = shalt.err (!%p2316_p10)
}
  0x34   : > { %s2320_s19 = scalar_lea.vmem %s2523_s21, 4096  ;;  %p2328_p4 = scmp.lt.s32.totalorder %s2523_s21, %s2523_s21 }
  0x35   : > { %p2321_p1 = scmp.ne.s32.totalorder %s2523_s21, %s2320_s19  ;;  %p2329_p7 = scmp.lt.s32.totalorder %s2320_s19, %s2320_s19 }
  0x37   : > { %p2323_p2 = pnand %p2321_p1, %p2281_p0  ;;  %p2330_p8 = por %p2329_p7, %p2328_p4 }
  0x39   : > { %p2324_p3 = pneg %p2323_p2 }
  0x3b   : > { %p2331_p11 = pnand %p2330_p8, %p2324_p3 }
  0x3d   : > { %2334 = shalt.err (!%p2331_p11)
}
  0x3e   : > { %s2409_s23 = smov 64   ;;  %s2410_s24 = smov 4  }
  0x3f   : > { %2119 = dma.hbm_to_vmem [thread:$0]  (!%p2519_p12), %s2809_s4, 4096, %s2523_s21, [#allocation6], %s2409_s23, %s2409_s23, %s2410_s24  }
  0x40   : > { %p2821_p13 = scmp.ne.s32.totalorder %s2819_s17, 0 }
  0x41   : > { %p2822_p0 = scmp.eq.s32.totalorder (!%p2821_p13), %s2483_s9, 0 }
  0x42   : > { %300 = sbr.rel (%p2821_p13) target bundleno = 2067 (0x813), region = 52 }
  0x49   : > { %2380 = dma.done.wait (%p2822_p0), [#allocation3], 16   ;;  %p2823_p6 = pmov %p2822_p0 }
  0x4a   : > { %p2824_p5 = pmov %p2822_p0 }
  0x4b   : > { %2382 = vsyncadd (%p2823_p6), [#allocation3], 4294967280 }
  0x4c   : > { %2384 = dma.done.wait (%p2824_p5), [#allocation6], 4096   ;;  %p2825_p9 = pmov %p2822_p0 }
  0x4d   : > { %s1799_s22 = sshll.u32 %s2483_s9, 3  ;;  %v2170_v0 = vld [vmem:[%s2807_s2] sm:$0xff]   ;;  %vm399_vm0 = vcmask 130048   ;;  %p349_p12 = scmp.lt.s32.totalorder %s2483_s9, 1  ;;  %vm542_vm1 = vcmask 523264   ;;  %v2180_v30 = vld [vmem:[#allocation5 + $0x48] sm:$0xff]  }
  0x4e   : > { %2386 = vsyncadd (%p2825_p9), [#allocation6], 4294963200  ;;  %p344_p10 = scmp.lt.s32.totalorder %s1799_s22, 15  ;;  %1944 = vmatprep.subr.bf16.mxu1 %v2170_v0  ;;  %v1803_v7 = vld [vmem:[#allocation2] ss:$0 sm:$0xff]  ;;  %v2179_v27 = vld [vmem:[#allocation5 + $0x40] sm:$0xff]  }
  0x4f   : > { %1945 = vmatpush3.bf16.msra.mxu1 %v2170_v0  ;;  %s350_s20 = scalar_select %p349_p12, %s2483_s9, 1  ;;  %v2181_v31 = vld [vmem:[#allocation5 + $0x50] sm:$0xff]   ;;  %v2182_v33 = vld [vmem:[#allocation5 + $0x58] sm:$0xff]   ;;  %v2183_v34 = vld [vmem:[#allocation5 + $0x60] sm:$0xff]   ;;  %vm2412_vm2 = vmmov 0   ;;  %vm1521_vm3 = vcmask 1041409  }
  0x50   : > { %s2833_s22 = smov (!%p344_p10, %s1799_s22), 15  ;;  %v2184_v35 = vld [vmem:[#allocation5 + $0x68] sm:$0xff]   ;;  %v2185_v36 = vld [vmem:[#allocation5 + $0x70] sm:$0xff]   ;;  %v2186_v37 = vld [vmem:[#allocation5 + $0x78] sm:$0xff]   ;;  %vm1523_vm4 = vcmask 1042434   ;;  %vm1525_vm5 = vcmask 1043459  }
  0x51   : > { %s1800_s17 = sshll.u32 %s2833_s22, 2  ;;  %s1871_s19 = sshll.u32 %s350_s20, 5  ;;  %v2187_v38 = vld [vmem:[#allocation5] sm:$0xff]   ;;  %v2188_v45 = vld [vmem:[#allocation5 + $0x8] sm:$0xff]   ;;  %v2189_v48 = vld [vmem:[#allocation5 + $0x10] sm:$0xff]   ;;  %vm1527_vm6 = vcmask 1044484  }
  0x52   : > { %s347_s12 = scalar_lea.vmem %s2805_s0, %s1800_s17  ;;  %s2594_s25 = scalar_lea.vmem %s2806_s1, %s1871_s19  ;;  %v2190_v53 = vld [vmem:[#allocation5 + $0x18] sm:$0xff]   ;;  %v2191_v54 = vld [vmem:[#allocation5 + $0x20] sm:$0xff]   ;;  %v2192_v55 = vld [vmem:[#allocation5 + $0x28] sm:$0xff]   ;;  %vm1529_vm7 = vcmask 1045509   ;;  %vm1531_vm8 = vcmask 1046534   ;;  %vm1533_vm9 = vcmask 1047559  }
  0x53   : > { %v2171_v1 = vld [vmem:[%s347_s12] sm:$0xff]   ;;  %v2172_v2 = vld [vmem:[%s347_s12 + $0x8] sm:$0xff]   ;;  %v2173_v3 = vld [vmem:[%s347_s12 + $0x10] sm:$0xff]   ;;  %vm1535_vm10 = vcmask 64512   ;;  %s340_s20 = sand.u32 1, %s2397_s28   ;;  %s1872_s24 = sshll.u32 %s2483_s9, 7 }
  0x54   : > { %1946 = vmatprep.mubr.msk.bf16.mxu1 %vm399_vm0, %v2171_v1  ;;  %v2174_v4 = vld [vmem:[%s347_s12 + $0x18] sm:$0xff]   ;;  %v2175_v5 = vld [vmem:[%s2594_s25] sm:$0xff]   ;;  %v2639_v28 = vld [vmem:[%s2594_s25 + $0x8] sm:$0xff]   ;;  %s1798_s19 = sshll.u32 %s340_s20, 3  ;;  %s2758_s17 = scalar_lea.hbm %s2813_s8, %s1872_s24 }
  0x55   : > { %1947 = vmatmul.mubr.msk.bf16.vlgmr.msra.gmra.mrb[0].mxu1 %vm399_vm0, %v2172_v2  ;;  %1962 = vmatprep.mubr.msk.bf16.mxu0 %vm542_vm1, %v2175_v5  ;;  %v2643_v29 = vld [vmem:[%s2594_s25 + $0x10] sm:$0xff]   ;;  %v2650_v32 = vld [vmem:[%s2594_s25 + $0x18] sm:$0xff]   ;;  %v1837_v58 = vld [vmem:[%s2810_s5] ss:$0 sm:$0xff]  ;;  %s342_s23 = scalar_lea.vmem [#allocation7], %s1798_s19  ;;  %s2764_s9 = scalar_lea.sflag [#allocation4], %s340_s20 }
  0x56   : > { %1950 = vmatprep.mubr.msk.bf16.mxu1 %vm399_vm0, %v2173_v3  ;;  %v2193_v56 = vld [vmem:[#allocation5 + $0x30] sm:$0xff]   ;;  %v2194_v57 = vld [vmem:[#allocation5 + $0x38] sm:$0xff]   ;;  %s1694_s25 = sshll.u32 %s342_s23, 4  ;;  %p2826_p2 = scmp.ne.s32.totalorder %s2817_s15, 0  ;;  %s2760_s25 = int_to_ptr.vmem [resolvable:$true] %s1694_s25 }
  0x57   : > { %s2335_s21 = scalar_lea.vmem %s2760_s25, 128  ;;  %s2414_s10 = smov [#allocation7]  }
  0x58   : > { %p2336_p1 = scmp.ne.s32.totalorder %s2760_s25, %s2335_s21  ;;  %s2339_s12 = sshll.u32 %s2414_s10, 4  ;;  %s2340_s12 = int_to_ptr.vmem [resolvable:$false] %s2339_s12 }
  0x59   : > { %s2341_s13 = scalar_lea.vmem %s2340_s12, 256  ;;  %p2342_p7 = scmp.lt.s32.totalorder %s2760_s25, %s2340_s12 }
  0x5a   : > { %p2337_p3 = pnand %p2336_p1, %p2826_p2  ;;  %p2343_p8 = scmp.lt.s32.totalorder %s2341_s13, %s2335_s21 }
  0x5c   : > { %p2338_p4 = pneg %p2337_p3  ;;  %p2344_p11 = por %p2343_p8, %p2342_p7 }
  0x5d   : > { %1951 = vmatmul.mubr.msk.bf16.gmra.mrb[4].mxu1 %vm399_vm0, %v2174_v4 }
  0x5e   : > { %2026 = vmatprep.mubr.msk.bf16.mxu1 %vm542_vm1, %v2175_v5  ;;  %p2345_p13 = pnand %p2344_p11, %p2338_p4 }
 0x128   : > { %v1948_v6 = vpop.f32.mrb[0].mxu1 }
 0x129   : > { %v446_v8 = vpop.f32.mrb[1].mxu1  ;;  %v2605_v14 = vadd.f32 %v1948_v6, %v1803_v7 }
 0x12a   : > { %v1949_v9 = vpop.f32.mrb[2].mxu1  ;;  %v2599_v11 = vadd.f32 %v1803_v7, %v446_v8 }
 0x12b   : > { %v449_v10 = vpop.f32.mrb[3].mxu1  ;;  %v2601_v12 = vadd.f32 %v1949_v9, %v1803_v7 }
 0x12c   : > { %v2603_v13 = vadd.f32 %v1803_v7, %v449_v10 }
 0x12d   : > { %v2613_v16 = vpack.c.bf16 %v2601_v12, %v2605_v14 }
 0x12e   : > { %v2609_v15 = vpack.c.bf16 %v2603_v13, %v2599_v11 }
 0x130   : > { %v1952_v17 = vpop.f32.mrb[4].mxu1  ;;  %1954 = vmatprep.subr.bf16.mxu0 %v2609_v15 }
 0x131   : > { %v462_v18 = vpop.f32.mrb[5].mxu1  ;;  %1955 = vmatpush3.bf16.msra.mxu0 %v2609_v15  ;;  %v2625_v24 = vadd.f32 %v1952_v17, %v1803_v7 }
 0x132   : > { %v1953_v19 = vpop.f32.mrb[6].mxu1  ;;  %1956 = vmatprep.subr.bf16.mxu0 %v2613_v16  ;;  %v2618_v21 = vadd.f32 %v1803_v7, %v462_v18 }
 0x133   : > { %v465_v20 = vpop.f32.mrb[7].mxu1  ;;  %v2620_v22 = vadd.f32 %v1953_v19, %v1803_v7 }
 0x134   : > { %v2622_v23 = vadd.f32 %v1803_v7, %v465_v20 }
 0x135   : > { %1957 = vmatpush3.bf16.msra.mxu0 %v2613_v16  ;;  %v2633_v26 = vpack.c.bf16 %v2620_v22, %v2625_v24 }
 0x136   : > { %v2629_v25 = vpack.c.bf16 %v2622_v23, %v2618_v21 }
 0x138   : > { %1958 = vmatprep.subr.bf16.mxu0 %v2629_v25 }
 0x139   : > { %1959 = vmatpush3.bf16.msra.mxu0 %v2629_v25 }
 0x13a   : > { %1960 = vmatprep.subr.bf16.mxu0 %v2633_v26 }
 0x13d   : > { %1961 = vmatpush3.bf16.msra.mxu0 %v2633_v26 }
 0x13e   : > { %1970 = vmatprep.subr.bf16.mxu0 %v2179_v27 }
 0x140   : > { %1963 = vmatmul.mubr.msk.bf16.vlgmr.msra.gmra.mrb[0].mxu0 %vm542_vm1, %v2639_v28 }
 0x141   : > { %1966 = vmatprep.mubr.msk.bf16.mxu0 %vm542_vm1, %v2643_v29  ;;  %1971 = vmatpush3.bf16.msra.mxu0 %v2179_v27 }
 0x142   : > { %1972 = vmatprep.subr.bf16.mxu0 %v2180_v30 }
 0x145   : > { %1973 = vmatpush3.bf16.msra.mxu0 %v2180_v30 }
 0x146   : > { %1974 = vmatprep.subr.bf16.mxu0 %v2181_v31 }
 0x148   : > { %1967 = vmatmul.mubr.msk.bf16.gmra.mrb[4].mxu0 %vm542_vm1, %v2650_v32 }
 0x149   : > { %1975 = vmatpush3.bf16.msra.mxu0 %v2181_v31 }
 0x14a   : > { %1976 = vmatprep.subr.bf16.mxu0 %v2182_v33 }
 0x14d   : > { %1977 = vmatpush3.bf16.msra.mxu0 %v2182_v33 }
 0x14e   : > { %1978 = vmatprep.subr.bf16.mxu0 %v2183_v34 }
 0x151   : > { %1979 = vmatpush3.bf16.msra.mxu0 %v2183_v34 }
 0x152   : > { %1980 = vmatprep.subr.bf16.mxu0 %v2184_v35 }
 0x155   : > { %1981 = vmatpush3.bf16.msra.mxu0 %v2184_v35 }
 0x156   : > { %1982 = vmatprep.subr.bf16.mxu0 %v2185_v36 }
 0x159   : > { %1983 = vmatpush3.bf16.msra.mxu0 %v2185_v36 }
 0x15a   : > { %1984 = vmatprep.subr.bf16.mxu0 %v2186_v37 }
 0x15d   : > { %1985 = vmatpush3.bf16.msra.mxu0 %v2186_v37 }
 0x15e   : > { %1994 = vmatprep.subr.bf16.mxu0 %v2187_v38 }
 0x213   : > { %v1964_v39 = vpop.f32.mrb[0].mxu0 }
 0x214   : > { %v589_v40 = vpop.f32.mrb[1].mxu0 }
 0x215   : > { %v1965_v41 = vpop.f32.mrb[2].mxu0 }
 0x216   : > { %v621_v42 = vpack.c.bf16 %v1965_v41, %v1964_v39  ;;  %v592_v43 = vpop.f32.mrb[3].mxu0 }
 0x217   : > { %v620_v44 = vpack.c.bf16 %v592_v43, %v589_v40 }
 0x219   : > { %1986 = vmatprep.mubr.bf16.mxu0 %v620_v44 }
 0x21a   : > { %1987 = vmatmul.mubr.bf16.vlgmr.msra.gmra.mrb[8].mxu0 %v621_v42 }
 0x21b   : > { %1995 = vmatpush3.bf16.msra.mxu0 %v2187_v38  ;;  %v1968_v46 = vpop.f32.mrb[4].mxu0 }
 0x21c   : > { %v605_v47 = vpop.f32.mrb[5].mxu0  ;;  %1996 = vmatprep.subr.bf16.mxu0 %v2188_v45 }
 0x21d   : > { %v1969_v49 = vpop.f32.mrb[6].mxu0 }
 0x21e   : > { %v623_v50 = vpack.c.bf16 %v1969_v49, %v1968_v46  ;;  %v608_v51 = vpop.f32.mrb[7].mxu0 }
 0x21f   : > { %v622_v52 = vpack.c.bf16 %v608_v51, %v605_v47  ;;  %1997 = vmatpush3.bf16.msra.mxu0 %v2188_v45 }
 0x220   : > { %1998 = vmatprep.subr.bf16.mxu0 %v2189_v48 }
 0x221   : > { %1990 = vmatprep.mubr.bf16.mxu0 %v622_v52 }
 0x222   : > { %1991 = vmatmul.mubr.bf16.gmra.mrb[12].mxu0 %v623_v50 }
 0x223   : > { %1999 = vmatpush3.bf16.msra.mxu0 %v2189_v48  ;;  %2010 = vmatprep.mubr.bf16.mxu0 %v2609_v15 }
 0x224   : > { %2000 = vmatprep.subr.bf16.mxu0 %v2190_v53 }
 0x227   : > { %2001 = vmatpush3.bf16.msra.mxu0 %v2190_v53 }
 0x228   : > { %2002 = vmatprep.subr.bf16.mxu0 %v2191_v54 }
 0x22b   : > { %2003 = vmatpush3.bf16.msra.mxu0 %v2191_v54 }
 0x22c   : > { %2004 = vmatprep.subr.bf16.mxu0 %v2192_v55 }
 0x22f   : > { %2005 = vmatpush3.bf16.msra.mxu0 %v2192_v55 }
 0x230   : > { %2006 = vmatprep.subr.bf16.mxu0 %v2193_v56 }
 0x233   : > { %2007 = vmatpush3.bf16.msra.mxu0 %v2193_v56 }
 0x234   : > { %2008 = vmatprep.subr.bf16.mxu0 %v2194_v57 }
 0x237   : > { %2009 = vmatpush3.bf16.msra.mxu0 %v2194_v57 }
 0x23a   : > { %2011 = vmatmul.mubr.bf16.vlgmr.msra.gmra.mrb[8].mxu0 %v2613_v16 }
 0x23b   : > { %2014 = vmatprep.mubr.bf16.mxu0 %v2629_v25 }
 0x242   : > { %2015 = vmatmul.mubr.bf16.gmra.mrb[12].mxu0 %v2633_v26 }
 0x30d   : > { %v2012_v59 = vpop.f32.mrb[8].mxu0 }
 0x30e   : > { %v858_v60 = vadd.f32 %v2012_v59, %v1837_v58  ;;  %v819_v61 = vpop.f32.mrb[9].mxu0 }
 0x30f   : > { %v856_v62 = vadd.f32 %v1837_v58, %v819_v61  ;;  %v2013_v63 = vpop.f32.mrb[10].mxu0 }
 0x310   : > { %v859_v0 = vadd.f32 %v2013_v63, %v1837_v58  ;;  %v822_v1 = vpop.f32.mrb[11].mxu0  ;;  %v866_v2 = vmul.f32 %v858_v60, %v858_v60 }
 0x311   : > { %v857_v3 = vadd.f32 %v1837_v58, %v822_v1  ;;  %v864_v4 = vmul.f32 %v856_v62, %v856_v62 }
 0x312   : > { %876 = vadd.xlane.f32.xlu1 %v866_v2  ;;  %v867_v5 = vmul.f32 %v859_v0, %v859_v0 }
 0x313   : > { %872 = vadd.xlane.f32.xlu0 %v864_v4  ;;  %v865_v7 = vmul.f32 %v857_v3, %v857_v3 }
 0x315   : > { %v2016_v6 = vpop.f32.mrb[12].mxu0 }
 0x316   : > { %878 = vadd.xlane.f32.xlu1 %v867_v5  ;;  %v835_v8 = vpop.f32.mrb[13].mxu0  ;;  %v862_v16 = vadd.f32 %v2016_v6, %v1837_v58 }
 0x317   : > { %v860_v9 = vadd.f32 %v1837_v58, %v835_v8  ;;  %874 = vadd.xlane.f32.xlu0 %v865_v7  ;;  %v2017_v10 = vpop.f32.mrb[14].mxu0 }
 0x318   : > { %v838_v15 = vpop.f32.mrb[15].mxu0  ;;  %v2661_v19 = vadd.f32 %v2017_v10, %v1837_v58  ;;  %v870_v25 = vmul.f32 %v862_v16, %v862_v16 }
 0x319   : > { %v861_v17 = vadd.f32 %v1837_v58, %v838_v15  ;;  %v868_v18 = vmul.f32 %v860_v9, %v860_v9 }
 0x31a   : > { %v871_v26 = vmul.f32 %v2661_v19, %v2661_v19 }
 0x31b   : > { %880 = vadd.xlane.f32.xlu0 %v868_v18  ;;  %v869_v20 = vmul.f32 %v861_v17, %v861_v17  ;;  %v2199_v18 = vld [vmem:[#allocation5 + $0xe0] sm:$0xff]  }
 0x31d   : > { %882 = vadd.xlane.f32.xlu1 %v869_v20  ;;  %v2203_v20 = vld [vmem:[#allocation5 + $0x80] sm:$0xff]  }
 0x31f   : > { %884 = vadd.xlane.f32.xlu0 %v870_v25 }
 0x321   : > { %886 = vadd.xlane.f32.xlu1 %v871_v26 }
 0x39f   : > { %v877_v27 = vpop.xlane.xlu1 %876 }
 0x3a0   : > { %v890_v30 = vmax.f32 %v877_v27, 1e-24  ;;  %v873_v31 = vpop.xlane.xlu0 %872 }
 0x3a1   : > { %v888_v33 = vmax.f32 %v873_v31, 1e-24 }
 0x3a2   : > { %2211 = vrsqrt.f32 %v890_v30 }
 0x3a3   : > { %2213 = vrsqrt.f32 %v888_v33  ;;  %v879_v34 = vpop.xlane.xlu1 %878  ;;  %v2204_v33 = vld [vmem:[#allocation5 + $0x88] sm:$0xff]  }
 0x3a4   : > { %v891_v35 = vmax.f32 %v879_v34, 1e-24  ;;  %v875_v36 = vpop.xlane.xlu0 %874 }
 0x3a5   : > { %v889_v37 = vmax.f32 %v875_v36, 1e-24  ;;  %v2205_v36 = vld [vmem:[#allocation5 + $0x90] sm:$0xff]  }
 0x3a6   : > { %2215 = vrsqrt.f32 %v891_v35 }
 0x3a7   : > { %2217 = vrsqrt.f32 %v889_v37 }
 0x3a8   : > { %v881_v38 = vpop.xlane.xlu0 %880 }
 0x3a9   : > { %v892_v39 = vmax.f32 %v881_v38, 1e-24 }
 0x3aa   : > { %v883_v40 = vpop.xlane.xlu1 %882 }
 0x3ab   : > { %2219 = vrsqrt.f32 %v892_v39  ;;  %v893_v41 = vmax.f32 %v883_v40, 1e-24 }
 0x3ac   : > { %v2212_v42 = vpop.eup %2211  ;;  %v885_v43 = vpop.xlane.xlu0 %884 }
 0x3ad   : > { %v2214_v44 = vpop.eup %2213  ;;  %2221 = vrsqrt.f32 %v893_v41  ;;  %v894_v45 = vmax.f32 %v885_v43, 1e-24  ;;  %v906_v50 = vmul.f32 %v2212_v42, %v858_v60  ;;  %v2206_v41 = vld [vmem:[#allocation5 + $0x98] sm:$0xff]   ;;  %v2207_v42 = vld [vmem:[#allocation5 + $0xa0] sm:$0xff]   ;;  %v2208_v43 = vld [vmem:[#allocation5 + $0xa8] sm:$0xff]  }
 0x3ae   : > { %v887_v46 = vpop.xlane.xlu1 %886  ;;  %v904_v47 = vmul.f32 %v2214_v44, %v856_v62  ;;  %v2209_v44 = vld [vmem:[#allocation5 + $0xb0] sm:$0xff]  }
 0x3af   : > { %2223 = vrsqrt.f32 %v894_v45  ;;  %v895_v48 = vmax.f32 %v887_v46, 1e-24  ;;  %v914_v57 = vmax.f32 %v906_v50, 0.0  ;;  %v2210_v45 = vld [vmem:[#allocation5 + $0xb8] sm:$0xff]  }
 0x3b0   : > { %v2216_v49 = vpop.eup %2215  ;;  %v912_v54 = vmax.f32 %v904_v47, 0.0  ;;  %v1859_v46 = vld [vmem:[%s2810_s5 + $0x1] ss:$0 sm:$0xff] }
 0x3b1   : > { %v2218_v51 = vpop.eup %2217  ;;  %2225 = vrsqrt.f32 %v895_v48  ;;  %v907_v52 = vmul.f32 %v2216_v49, %v859_v0  ;;  %v2679_v1 = vadd.f32 %v914_v57, %v2605_v14 }
 0x3b2   : > { %v905_v53 = vmul.f32 %v2218_v51, %v857_v3  ;;  %v2666_v59 = vadd.f32 %v912_v54, %v2599_v11 }
 0x3b3   : > { %v915_v55 = vmax.f32 %v907_v52, 0.0 }
 0x3b4   : > { %v913_v56 = vmax.f32 %v905_v53, 0.0 }
 0x3b5   : > { %v2220_v58 = vpop.eup %2219  ;;  %v2672_v62 = vadd.f32 %v915_v55, %v2601_v12 }
 0x3b6   : > { %v2669_v61 = vadd.f32 %v913_v56, %v2603_v13  ;;  %v908_v63 = vmul.f32 %v2220_v58, %v860_v9 }
 0x3b7   : > { %v2222_v60 = vpop.eup %2221  ;;  %v2684_v11 = vpack.c.bf16 %v2672_v62, %v2679_v1 }
 0x3b8   : > { %v2676_v0 = vpack.c.bf16 %v2669_v61, %v2666_v59  ;;  %v909_v2 = vmul.f32 %v2222_v60, %v861_v17  ;;  %v916_v3 = vmax.f32 %v908_v63, 0.0  ;;  %v2196_v17 = vld [vmem:[#allocation5 + $0xc8] sm:$0xff]  }
 0x3b9   : > { %v2224_v4 = vpop.eup %2223 }
 0x3ba   : > { %2018 = vmatprep.subr.bf16.mxu1 %v2676_v0  ;;  %v917_v12 = vmax.f32 %v909_v2, 0.0  ;;  %v910_v13 = vmul.f32 %v2224_v4, %v862_v16  ;;  %v2689_v6 = vadd.f32 %v916_v3, %v2618_v21  ;;  %v2195_v16 = vld [vmem:[#allocation5 + $0xc0] sm:$0xff]  }
 0x3bb   : > { %v2226_v5 = vpop.eup %2225  ;;  %2019 = vmatpush3.bf16.msra.mxu1 %v2676_v0 }
 0x3bc   : > { %2020 = vmatprep.subr.bf16.mxu1 %v2684_v11  ;;  %v2692_v14 = vadd.f32 %v917_v12, %v2622_v23  ;;  %v911_v7 = vmul.f32 %v2226_v5, %v2661_v19  ;;  %v918_v8 = vmax.f32 %v910_v13, 0.0  ;;  %v2200_v19 = vld [vmem:[#allocation5 + $0xe8] sm:$0xff]  }
 0x3be   : > { %v2697_v9 = vpack.c.bf16 %v2692_v14, %v2689_v6  ;;  %v919_v10 = vmax.f32 %v911_v7, 0.0  ;;  %v2702_v15 = vadd.f32 %v918_v8, %v2625_v24  ;;  %v2198_v24 = vld [vmem:[#allocation5 + $0xd8] sm:$0xff]  }
 0x3bf   : > { %2021 = vmatpush3.bf16.msra.mxu1 %v2684_v11 }
 0x3c0   : > { %2022 = vmatprep.subr.bf16.mxu1 %v2697_v9  ;;  %v2705_v21 = vadd.f32 %v919_v10, %v2620_v22  ;;  %v2197_v22 = vld [vmem:[#allocation5 + $0xd0] sm:$0xff]  }
 0x3c2   : > { %v2709_v23 = vpack.c.bf16 %v2705_v21, %v2702_v15 }
 0x3c3   : > { %2023 = vmatpush3.bf16.msra.mxu1 %v2697_v9 }
 0x3c4   : > { %2024 = vmatprep.subr.bf16.mxu1 %v2709_v23 }
 0x3c7   : > { %2025 = vmatpush3.bf16.msra.mxu1 %v2709_v23 }
 0x3c8   : > { %2034 = vmatprep.subr.bf16.mxu1 %v2195_v16 }
 0x3ca   : > { %2027 = vmatmul.mubr.msk.bf16.vlgmr.msra.gmra.mrb[8].mxu1 %vm542_vm1, %v2639_v28  ;;  %v2201_v28 = vld [vmem:[#allocation5 + $0xf0] sm:$0xff]  }
 0x3cb   : > { %2030 = vmatprep.mubr.msk.bf16.mxu1 %vm542_vm1, %v2643_v29  ;;  %2035 = vmatpush3.bf16.msra.mxu1 %v2195_v16  ;;  %v2202_v29 = vld [vmem:[#allocation5 + $0xf8] sm:$0xff]  }
 0x3cc   : > { %2036 = vmatprep.subr.bf16.mxu1 %v2196_v17 }
 0x3cf   : > { %2037 = vmatpush3.bf16.msra.mxu1 %v2196_v17 }
 0x3d0   : > { %2038 = vmatprep.subr.bf16.mxu1 %v2197_v22 }
 0x3d2   : > { %2031 = vmatmul.mubr.msk.bf16.gmra.mrb[12].mxu1 %vm542_vm1, %v2650_v32 }
 0x3d3   : > { %2039 = vmatpush3.bf16.msra.mxu1 %v2197_v22 }
 0x3d4   : > { %2040 = vmatprep.subr.bf16.mxu1 %v2198_v24 }
 0x3d7   : > { %2041 = vmatpush3.bf16.msra.mxu1 %v2198_v24 }
 0x3d8   : > { %2042 = vmatprep.subr.bf16.mxu1 %v2199_v18 }
 0x3db   : > { %2043 = vmatpush3.bf16.msra.mxu1 %v2199_v18 }
 0x3dc   : > { %2044 = vmatprep.subr.bf16.mxu1 %v2200_v19 }
 0x3df   : > { %2045 = vmatpush3.bf16.msra.mxu1 %v2200_v19 }
 0x3e0   : > { %2046 = vmatprep.subr.bf16.mxu1 %v2201_v28 }
 0x3e3   : > { %2047 = vmatpush3.bf16.msra.mxu1 %v2201_v28 }
 0x3e4   : > { %2048 = vmatprep.subr.bf16.mxu1 %v2202_v29 }
 0x3e7   : > { %2049 = vmatpush3.bf16.msra.mxu1 %v2202_v29 }
 0x3e8   : > { %2058 = vmatprep.subr.bf16.mxu1 %v2203_v20 }
 0x49d   : > { %v2028_v25 = vpop.f32.mrb[8].mxu1 }
 0x49e   : > { %v1001_v26 = vpop.f32.mrb[9].mxu1 }
 0x49f   : > { %v2029_v32 = vpop.f32.mrb[10].mxu1 }
 0x4a0   : > { %v1033_v27 = vpack.c.bf16 %v2029_v32, %v2028_v25  ;;  %v1004_v30 = vpop.f32.mrb[11].mxu1 }
 0x4a1   : > { %v1032_v31 = vpack.c.bf16 %v1004_v30, %v1001_v26 }
 0x4a3   : > { %2050 = vmatprep.mubr.bf16.mxu1 %v1032_v31 }
 0x4a4   : > { %2051 = vmatmul.mubr.bf16.vlgmr.msra.gmra.mrb[16].mxu1 %v1033_v27 }
 0x4a5   : > { %2059 = vmatpush3.bf16.msra.mxu1 %v2203_v20  ;;  %v2032_v34 = vpop.f32.mrb[12].mxu1 }
 0x4a6   : > { %v1017_v35 = vpop.f32.mrb[13].mxu1  ;;  %2060 = vmatprep.subr.bf16.mxu1 %v2204_v33 }
 0x4a7   : > { %v2033_v37 = vpop.f32.mrb[14].mxu1 }
 0x4a8   : > { %v1035_v38 = vpack.c.bf16 %v2033_v37, %v2032_v34  ;;  %v1020_v39 = vpop.f32.mrb[15].mxu1 }
 0x4a9   : > { %v1034_v40 = vpack.c.bf16 %v1020_v39, %v1017_v35  ;;  %2061 = vmatpush3.bf16.msra.mxu1 %v2204_v33 }
 0x4aa   : > { %2062 = vmatprep.subr.bf16.mxu1 %v2205_v36 }
 0x4ab   : > { %2054 = vmatprep.mubr.bf16.mxu1 %v1034_v40 }
 0x4ac   : > { %2055 = vmatmul.mubr.bf16.gmra.mrb[20].mxu1 %v1035_v38 }
 0x4ad   : > { %2063 = vmatpush3.bf16.msra.mxu1 %v2205_v36  ;;  %2074 = vmatprep.mubr.bf16.mxu1 %v2676_v0 }
 0x4ae   : > { %2064 = vmatprep.subr.bf16.mxu1 %v2206_v41 }
 0x4b1   : > { %2065 = vmatpush3.bf16.msra.mxu1 %v2206_v41 }
 0x4b2   : > { %2066 = vmatprep.subr.bf16.mxu1 %v2207_v42 }
 0x4b5   : > { %2067 = vmatpush3.bf16.msra.mxu1 %v2207_v42 }
 0x4b6   : > { %2068 = vmatprep.subr.bf16.mxu1 %v2208_v43 }
 0x4b9   : > { %2069 = vmatpush3.bf16.msra.mxu1 %v2208_v43 }
 0x4ba   : > { %2070 = vmatprep.subr.bf16.mxu1 %v2209_v44 }
 0x4bd   : > { %2071 = vmatpush3.bf16.msra.mxu1 %v2209_v44 }
 0x4be   : > { %2072 = vmatprep.subr.bf16.mxu1 %v2210_v45 }
 0x4c1   : > { %2073 = vmatpush3.bf16.msra.mxu1 %v2210_v45 }
 0x4c4   : > { %2075 = vmatmul.mubr.bf16.vlgmr.msra.gmra.mrb[16].mxu1 %v2684_v11 }
 0x4c5   : > { %2078 = vmatprep.mubr.bf16.mxu1 %v2697_v9 }
 0x4cc   : > { %2079 = vmatmul.mubr.bf16.gmra.mrb[20].mxu1 %v2709_v23 }
 0x597   : > { %v2076_v47 = vpop.f32.mrb[16].mxu1 }
 0x598   : > { %v1270_v48 = vadd.f32 %v2076_v47, %v1859_v46  ;;  %v1231_v49 = vpop.f32.mrb[17].mxu1 }
 0x599   : > { %v2077_v50 = vpop.f32.mrb[18].mxu1  ;;  %v1268_v51 = vadd.f32 %v1859_v46, %v1231_v49 }
 0x59a   : > { %v1271_v52 = vadd.f32 %v2077_v50, %v1859_v46  ;;  %v1234_v53 = vpop.f32.mrb[19].mxu1  ;;  %v1278_v54 = vmul.f32 %v1270_v48, %v1270_v48 }
 0x59b   : > { %v1269_v55 = vadd.f32 %v1859_v46, %v1234_v53  ;;  %v1276_v57 = vmul.f32 %v1268_v51, %v1268_v51 }
 0x59c   : > { %1288 = vadd.xlane.f32.xlu0 %v1278_v54  ;;  %v1279_v56 = vmul.f32 %v1271_v52, %v1271_v52 }
 0x59d   : > { %v1277_v60 = vmul.f32 %v1269_v55, %v1269_v55 }
 0x59e   : > { %1290 = vadd.xlane.f32.xlu1 %v1279_v56 }
 0x59f   : > { %v2080_v58 = vpop.f32.mrb[20].mxu1 }
 0x5a0   : > { %1284 = vadd.xlane.f32.xlu0 %v1276_v57  ;;  %v1247_v63 = vpop.f32.mrb[21].mxu1  ;;  %v2727_v4 = vadd.f32 %v2080_v58, %v1859_v46 }
 0x5a1   : > { %v1272_v0 = vadd.f32 %v1859_v46, %v1247_v63  ;;  %v2081_v2 = vpop.f32.mrb[22].mxu1 }
 0x5a2   : > { %1286 = vadd.xlane.f32.xlu1 %v1277_v60  ;;  %v1250_v3 = vpop.f32.mrb[23].mxu1  ;;  %v2729_v13 = vadd.f32 %v2081_v2, %v1859_v46  ;;  %v1282_v7 = vmul.f32 %v2727_v4, %v2727_v4 }
 0x5a3   : > { %v1273_v11 = vadd.f32 %v1859_v46, %v1250_v3  ;;  %v1280_v12 = vmul.f32 %v1272_v0, %v1272_v0 }
 0x5a4   : > { %v1283_v8 = vmul.f32 %v2729_v13, %v2729_v13 }
 0x5a5   : > { %1292 = vadd.xlane.f32.xlu0 %v1280_v12  ;;  %v1281_v5 = vmul.f32 %v1273_v11, %v1273_v11 }
 0x5a7   : > { %1294 = vadd.xlane.f32.xlu1 %v1281_v5 }
 0x5a9   : > { %1296 = vadd.xlane.f32.xlu0 %v1282_v7 }
 0x5ab   : > { %1298 = vadd.xlane.f32.xlu1 %v1283_v8 }
 0x629   : > { %v1289_v9 = vpop.xlane.xlu0 %1288 }
 0x62a   : > { %v1302_v10 = vmax.f32 %v1289_v9, 1e-24 }
 0x62b   : > { %v1291_v23 = vpop.xlane.xlu1 %1290 }
 0x62c   : > { %2227 = vrsqrt.f32 %v1302_v10  ;;  %v1303_v16 = vmax.f32 %v1291_v23, 1e-24 }
 0x62d   : > { %v1285_v17 = vpop.xlane.xlu0 %1284 }
 0x62e   : > { %2229 = vrsqrt.f32 %v1303_v16  ;;  %v1300_v22 = vmax.f32 %v1285_v17, 1e-24 }
 0x62f   : > { %v1287_v24 = vpop.xlane.xlu1 %1286 }
 0x630   : > { %2231 = vrsqrt.f32 %v1300_v22  ;;  %v1301_v18 = vmax.f32 %v1287_v24, 1e-24 }
 0x632   : > { %2233 = vrsqrt.f32 %v1301_v18  ;;  %v1293_v19 = vpop.xlane.xlu0 %1292 }
 0x633   : > { %v1304_v28 = vmax.f32 %v1293_v19, 1e-24 }
 0x634   : > { %v1295_v29 = vpop.xlane.xlu1 %1294 }
 0x635   : > { %2235 = vrsqrt.f32 %v1304_v28  ;;  %v1305_v20 = vmax.f32 %v1295_v29, 1e-24 }
 0x636   : > { %v2228_v25 = vpop.eup %2227  ;;  %v1297_v26 = vpop.xlane.xlu0 %1296 }
 0x637   : > { %v1318_v32 = vmul.f32 %v2228_v25, %v1270_v48  ;;  %2237 = vrsqrt.f32 %v1305_v20  ;;  %v1306_v27 = vmax.f32 %v1297_v26, 1e-24 }
 0x638   : > { %v2230_v30 = vpop.eup %2229  ;;  %v1299_v31 = vpop.xlane.xlu1 %1298 }
 0x639   : > { %v1319_v33 = vmul.f32 %v2230_v30, %v1271_v52  ;;  %2239 = vrsqrt.f32 %v1306_v27  ;;  %v1307_v34 = vmax.f32 %v1299_v31, 1e-24  ;;  %v1326_v35 = vmax.f32 %v1318_v32, 0.0 }
 0x63a   : > { %v2232_v36 = vpop.eup %2231 }
 0x63b   : > { %v1316_v37 = vmul.f32 %v2232_v36, %v1268_v51  ;;  %2241 = vrsqrt.f32 %v1307_v34  ;;  %v1334_v38 = vadd.f32 %v1326_v35, %v2679_v1  ;;  %v1327_v39 = vmax.f32 %v1319_v33, 0.0 }
 0x63c   : > { %v2234_v40 = vpop.eup %2233 }
 0x63d   : > { %v1317_v41 = vmul.f32 %v2234_v40, %v1269_v55  ;;  %v1352_v42 = vrot.slane %v1334_v38, 4  ;;  %v1335_v43 = vadd.f32 %v1327_v39, %v2672_v62  ;;  %v1324_v44 = vmax.f32 %v1316_v37, 0.0 }
 0x63f   : > { %v2236_v45 = vpop.eup %2235  ;;  %v1353_v46 = vadd.f32 %v1352_v42, %v1334_v38  ;;  %v1358_v47 = vrot.slane %v1335_v43, 4  ;;  %v1332_v48 = vadd.f32 %v1324_v44, %v2666_v59  ;;  %v1325_v49 = vmax.f32 %v1317_v41, 0.0 }
 0x640   : > { %v1320_v50 = vmul.f32 %v2236_v45, %v1272_v0 }
 0x641   : > { %v2238_v52 = vpop.eup %2237  ;;  %v1354_v53 = vrot.slane %v1353_v46, 2  ;;  %v1359_v51 = vadd.f32 %v1358_v47, %v1335_v43  ;;  %v1340_v54 = vrot.slane %v1332_v48, 4  ;;  %v1333_v1 = vadd.f32 %v1325_v49, %v2669_v61 }
 0x642   : > { %v1321_v56 = vmul.f32 %v2238_v52, %v1273_v11  ;;  %v1328_v57 = vmax.f32 %v1320_v50, 0.0 }
 0x643   : > { %v2240_v55 = vpop.eup %2239  ;;  %v1355_v58 = vadd.f32 %v1354_v53, %v1353_v46  ;;  %v1360_v63 = vrot.slane %v1359_v51, 2  ;;  %v1341_v62 = vadd.f32 %v1340_v54, %v1332_v48  ;;  %v1346_v60 = vrot.slane %v1333_v1, 4 }
 0x644   : > { %v1322_v2 = vmul.f32 %v2240_v55, %v2727_v4  ;;  %v1336_v3 = vadd.f32 %v1328_v57, %v2689_v6  ;;  %v1329_v59 = vmax.f32 %v1321_v56, 0.0  ;;  %v1397_v6 = vld [vmem:[%s2811_s6] sm:$0xff] }
 0x645   : > { %v2242_v12 = vpop.eup %2241  ;;  %v1356_v0 = vrot.slane %v1355_v58, 1  ;;  %v1361_v5 = vadd.f32 %v1360_v63, %v1359_v51  ;;  %v1342_v7 = vrot.slane %v1341_v62, 2  ;;  %v1347_v8 = vadd.f32 %v1346_v60, %v1333_v1 }
 0x646   : > { %v1323_v9 = vmul.f32 %v2242_v12, %v2729_v13  ;;  %v1364_v61 = vrot.slane %v1336_v3, 4  ;;  %v1337_v11 = vadd.f32 %v1329_v59, %v2692_v14  ;;  %v1330_v10 = vmax.f32 %v1322_v2, 0.0 }
 0x647   : > { %v1357_v23 = vadd.f32 %v1356_v0, %v1355_v58  ;;  %v1362_v16 = vrot.slane %v1361_v5, 1  ;;  %v1343_v17 = vadd.f32 %v1342_v7, %v1341_v62  ;;  %v1348_v22 = vrot.slane %v1347_v8, 2 }
 0x648   : > { %v1365_v4 = vadd.f32 %v1364_v61, %v1336_v3  ;;  %v1370_v24 = vrot.slane %v1337_v11, 4  ;;  %v1338_v18 = vadd.f32 %v1330_v10, %v2702_v15  ;;  %v1331_v19 = vmax.f32 %v1323_v9, 0.0  ;;  %v1478_v61 = vld [vmem:[%s2812_s7] sm:$0xff] }
 0x649   : > { %v1391_v28 = vmul.f32 0.125, %v1357_v23  ;;  %v1363_v29 = vadd.f32 %v1362_v16, %v1361_v5  ;;  %v1344_v13 = vrot.slane %v1343_v17, 1  ;;  %v1349_v20 = vadd.f32 %v1348_v22, %v1347_v8 }
 0x64a   : > { %v1366_v25 = vrot.slane %v1365_v4, 2  ;;  %v1371_v14 = vadd.f32 %v1370_v24, %v1337_v11  ;;  %v1376_v26 = vrot.slane %v1338_v18, 4  ;;  %v1339_v32 = vadd.f32 %v1331_v19, %v2705_v21 }
 0x64b   : > { %v1400_v27 = vsub.f32 %v1391_v28, %v1397_v6  ;;  %v1392_v30 = vmul.f32 0.125, %v1363_v29  ;;  %v1345_v31 = vadd.f32 %v1344_v13, %v1343_v17  ;;  %v1350_v33 = vrot.slane %v1349_v20, 1 }
 0x64c   : > { %v1367_v34 = vadd.f32 %v1366_v25, %v1365_v4  ;;  %v1372_v35 = vrot.slane %v1371_v14, 2  ;;  %v1377_v36 = vadd.f32 %v1376_v26, %v1338_v18  ;;  %v1382_v37 = vrot.slane %v1339_v32, 4 }
 0x64d   : > { %v1408_v38 = vmul.f32 %v1400_v27, %v1400_v27  ;;  %v1401_v15 = vsub.f32 %v1392_v30, %v1397_v6  ;;  %v1389_v39 = vmul.f32 0.125, %v1345_v31  ;;  %v1351_v40 = vadd.f32 %v1350_v33, %v1349_v20 }
 0x64e   : > { %v1368_v41 = vrot.slane %v1367_v34, 1  ;;  %v1373_v42 = vadd.f32 %v1372_v35, %v1371_v14  ;;  %v1378_v43 = vrot.slane %v1377_v36, 2  ;;  %v1383_v44 = vadd.f32 %v1382_v37, %v1339_v32 }
 0x64f   : > { %1418 = vadd.xlane.f32.xlu0 %v1408_v38  ;;  %v1409_v45 = vmul.f32 %v1401_v15, %v1401_v15  ;;  %v1398_v46 = vsub.f32 %v1389_v39, %v1397_v6  ;;  %v1390_v21 = vmul.f32 0.125, %v1351_v40  ;;  %v2411_v11 = vmov 0.0  }
 0x650   : > { %v1369_v47 = vadd.f32 %v1368_v41, %v1367_v34  ;;  %v1374_v48 = vrot.slane %v1373_v42, 1  ;;  %v1379_v49 = vadd.f32 %v1378_v43, %v1377_v36  ;;  %v1384_v50 = vrot.slane %v1383_v44, 2  ;;  %2082 = vmatprep.subr.mxu0 %v2411_v11  ;;  %2084 = vmatprep.mubr.msk.f32.mxu0 %vm2412_vm2, %v2411_v11 }
 0x651   : > { %1420 = vadd.xlane.f32.xlu1 %v1409_v45  ;;  %v1406_v52 = vmul.f32 %v1398_v46, %v1398_v46  ;;  %v1399_v53 = vsub.f32 %v1390_v21, %v1397_v6  ;;  %2083 = vmatpush3.msra.mxu0 %v1478_v61 }
 0x652   : > { %v1393_v51 = vmul.f32 0.125, %v1369_v47  ;;  %v1375_v54 = vadd.f32 %v1374_v48, %v1373_v42  ;;  %v1380_v1 = vrot.slane %v1379_v49, 1  ;;  %v1385_v56 = vadd.f32 %v1384_v50, %v1383_v44 }
 0x653   : > { %1414 = vadd.xlane.f32.xlu0 %v1406_v52  ;;  %v1407_v57 = vmul.f32 %v1399_v53, %v1399_v53  ;;  %v1487_v44 = vlaneseq }
 0x654   : > { %v1402_v55 = vsub.f32 %v1393_v51, %v1397_v6  ;;  %v1394_v58 = vmul.f32 0.125, %v1375_v54  ;;  %v1381_v63 = vadd.f32 %v1380_v1, %v1379_v49  ;;  %v1386_v62 = vrot.slane %v1385_v56, 1 }
 0x655   : > { %1416 = vadd.xlane.f32.xlu1 %v1407_v57  ;;  %v1488_v49 = vand.u32 127, %v1487_v44  ;;  %v1490_v50 = vshrl.u32 %v1487_v44, 7 }
 0x656   : > { %v1410_v60 = vmul.f32 %v1402_v55, %v1402_v55  ;;  %v1403_v2 = vsub.f32 %v1394_v58, %v1397_v6  ;;  %v1395_v3 = vmul.f32 0.125, %v1381_v63  ;;  %v1387_v59 = vadd.f32 %v1386_v62, %v1385_v56 }
 0x657   : > { %v1491_v55 = vsub.s32 %v1488_v49, %v1490_v50 }
 0x658   : > { %1422 = vadd.xlane.f32.xlu0 %v1410_v60  ;;  %v1411_v12 = vmul.f32 %v1403_v2, %v1403_v2  ;;  %v1404_v0 = vsub.f32 %v1395_v3, %v1397_v6  ;;  %v1396_v5 = vmul.f32 0.125, %v1387_v59 }
 0x65a   : > { %1424 = vadd.xlane.f32.xlu1 %v1411_v12  ;;  %v1412_v7 = vmul.f32 %v1404_v0, %v1404_v0  ;;  %v1405_v8 = vsub.f32 %v1396_v5, %v1397_v6 }
 0x65c   : > { %1426 = vadd.xlane.f32.xlu0 %v1412_v7  ;;  %v1413_v9 = vmul.f32 %v1405_v8, %v1405_v8 }
 0x65e   : > { %1428 = vadd.xlane.f32.xlu1 %v1413_v9 }
 0x6dc   : > { %v1419_v10 = vpop.xlane.xlu0 %1418 }
 0x6dd   : > { %v1440_v23 = vadd.f32 1e-12, %v1419_v10  ;;  %v1432_v29 = vadd.f32 1.0, %v1419_v10 }
 0x6de   : > { %v1421_v16 = vpop.xlane.xlu1 %1420 }
 0x6df   : > { %2243 = vrcp.f32 %v1440_v23  ;;  %v1441_v17 = vadd.f32 1e-12, %v1421_v16  ;;  %v1433_v26 = vadd.f32 1.0, %v1421_v16 }
 0x6e0   : > { %v1415_v22 = vpop.xlane.xlu0 %1414 }
 0x6e1   : > { %2245 = vrcp.f32 %v1441_v17  ;;  %v1438_v6 = vadd.f32 1e-12, %v1415_v22  ;;  %v1430_v33 = vadd.f32 1.0, %v1415_v22 }
 0x6e2   : > { %v1417_v4 = vpop.xlane.xlu1 %1416 }
 0x6e3   : > { %2247 = vrcp.f32 %v1438_v6  ;;  %v1439_v24 = vadd.f32 1e-12, %v1417_v4  ;;  %v1431_v37 = vadd.f32 1.0, %v1417_v4 }
 0x6e5   : > { %2249 = vrcp.f32 %v1439_v24  ;;  %v1423_v18 = vpop.xlane.xlu0 %1422 }
 0x6e6   : > { %v1442_v19 = vadd.f32 1e-12, %v1423_v18  ;;  %v1434_v39 = vadd.f32 1.0, %v1423_v18 }
 0x6e7   : > { %v1425_v28 = vpop.xlane.xlu1 %1424 }
 0x6e8   : > { %2251 = vrcp.f32 %v1442_v19  ;;  %v1443_v13 = vadd.f32 1e-12, %v1425_v28  ;;  %v1435_v42 = vadd.f32 1.0, %v1425_v28 }
 0x6e9   : > { %v2244_v20 = vpop.eup %2243  ;;  %v1427_v25 = vpop.xlane.xlu0 %1426 }
 0x6ea   : > { %v1451_v14 = vmul.f32 %v2244_v20, %v1432_v29  ;;  %2253 = vrcp.f32 %v1443_v13  ;;  %v1444_v32 = vadd.f32 1e-12, %v1427_v25  ;;  %v1436_v21 = vadd.f32 1.0, %v1427_v25 }
 0x6eb   : > { %v2246_v27 = vpop.eup %2245  ;;  %v1429_v30 = vpop.xlane.xlu1 %1428 }
 0x6ec   : > { %2255 = vlog2.f32 %v1451_v14  ;;  %v1453_v31 = vmul.f32 %v2246_v27, %v1433_v26  ;;  %v1445_v34 = vadd.f32 1e-12, %v1429_v30  ;;  %v1437_v53 = vadd.f32 1.0, %v1429_v30 }
 0x6ed   : > { %v2248_v35 = vpop.eup %2247  ;;  %2257 = vrcp.f32 %v1444_v32  ;;  %v2413_v26 = vmov 1966171168  }
 0x6ee   : > { %2259 = vlog2.f32 %v1453_v31  ;;  %v1447_v36 = vmul.f32 %v2248_v35, %v1430_v33  ;;  %v1617_v32 = vunpack.c.l.s4 %v2413_v26 }
 0x6ef   : > { %v2250_v38 = vpop.eup %2249  ;;  %2261 = vrcp.f32 %v1445_v34 }
 0x6f0   : > { %2263 = vlog2.f32 %v1447_v36  ;;  %v1449_v15 = vmul.f32 %v2250_v38, %v1431_v37  ;;  %v1618_v27 = vunpack.c.0.s8 %v1617_v32 }
 0x6f2   : > { %v2252_v40 = vpop.eup %2251  ;;  %2265 = vlog2.f32 %v1449_v15  ;;  %v1621_v30 = vsub.s32 %v1618_v27, %v1490_v50 }
 0x6f3   : > { %v1455_v41 = vmul.f32 %v2252_v40, %v1434_v39 }
 0x6f4   : > { %v2254_v43 = vpop.eup %2253 }
 0x6f5   : > { %2267 = vlog2.f32 %v1455_v41  ;;  %v1457_v45 = vmul.f32 %v2254_v43, %v1435_v42 }
 0x6f6   : > { %v2256_v46 = vpop.eup %2255 }
 0x6f7   : > { %v2258_v47 = vpop.eup %2257  ;;  %2269 = vlog2.f32 %v1457_v45  ;;  %v1467_v58 = vmul.f32 0.6931472, %v2256_v46 }
 0x6f8   : > { %v2260_v48 = vpop.eup %2259  ;;  %v1459_v52 = vmul.f32 %v2258_v47, %v1436_v21 }
 0x6f9   : > { %v2262_v51 = vpop.eup %2261  ;;  %v1469_v63 = vmul.f32 0.6931472, %v2260_v48  ;;  %v1500_v59 = vrot.slane %v1467_v58, %v1491_v55 }
 0x6fa   : > { %v2264_v54 = vpop.eup %2263  ;;  %2271 = vlog2.f32 %v1459_v52  ;;  %v1461_v1 = vmul.f32 %v2262_v51, %v1437_v53 }
 0x6fb   : > { %v1463_v56 = vmul.f32 0.6931472, %v2264_v54  ;;  %v1504_v5 = vrot.slane %v1469_v63, %v1491_v55 }
 0x6fc   : > { %v2266_v57 = vpop.eup %2265  ;;  %2273 = vlog2.f32 %v1461_v1 }
 0x6fd   : > { %v1465_v62 = vmul.f32 0.6931472, %v2266_v57  ;;  %v1492_v2 = vrot.slane %v1463_v56, %v1491_v55 }
 0x6ff   : > { %v2268_v60 = vpop.eup %2267  ;;  %v1496_v3 = vrot.slane %v1465_v62, %v1491_v55 }
 0x700   : > { %v1471_v12 = vmul.f32 0.6931472, %v2268_v60 }
 0x701   : > { %v2270_v0 = vpop.eup %2269  ;;  %v1522_v7 = vsel %vm1521_vm3, %v1496_v3, %v1492_v2 }
 0x702   : > { %v1524_v8 = vsel %vm1523_vm4, %v1500_v59, %v1522_v7  ;;  %v1508_v9 = vrot.slane %v1471_v12, %v1491_v55  ;;  %v1473_v61 = vmul.f32 0.6931472, %v2270_v0 }
 0x703   : > { %v1526_v11 = vsel %vm1525_vm5, %v1504_v5, %v1524_v8 }
 0x704   : > { %v2272_v10 = vpop.eup %2271  ;;  %v1528_v23 = vsel %vm1527_vm6, %v1508_v9, %v1526_v11  ;;  %v1512_v16 = vrot.slane %v1473_v61, %v1491_v55 }
 0x705   : > { %v1475_v17 = vmul.f32 0.6931472, %v2272_v10 }
 0x706   : > { %v2274_v22 = vpop.eup %2273  ;;  %v1530_v6 = vsel %vm1529_vm7, %v1512_v16, %v1528_v23 }
 0x707   : > { %v1516_v4 = vrot.slane %v1475_v17, %v1491_v55  ;;  %v1477_v24 = vmul.f32 0.6931472, %v2274_v22 }
 0x709   : > { %v1520_v18 = vrot.slane %v1477_v24, %v1491_v55  ;;  %v1532_v19 = vsel %vm1531_vm8, %v1516_v4, %v1530_v6 }
 0x70b   : > { %v1534_v28 = vsel %vm1533_vm9, %v1520_v18, %v1532_v19 }
 0x70c   : > { %2085 = vmatmul.mubr.msk.f32.vlgmr.msra.gmra.mrb[16].mxu0 %vm1535_vm10, %v1534_v28 }
 0x7df   : > { %v1604_v29 = vpop.f32.mrb[16].mxu0 }
 0x7e0   : > { %v1861_v13 = vmul.f32 -1.442695, %v1604_v29  ;;  %v2086_v20 = vpop.f32.mrb[17].mxu0 }
 0x7e2   : > { %2275 = vpow2.f32 %v1861_v13 }
 0x7ec   : > { %v2276_v25 = vpop.eup %2275 }
 0x7ed   : > { %v1611_v14 = vadd.f32 1.0, %v2276_v25 }
 0x7ef   : > { %2277 = vrcp.f32 %v1611_v14 }
 0x7f9   : > { %v2278_v31 = vpop.eup %2277 }
 0x7fa   : > { %v1615_v33 = vcombine.high %v2278_v31, %v2278_v31  ;;  %v1622_v34 = vrot.slane %v2278_v31, %v1621_v30 }
 0x7fc   : > { %v1629_v35 = vrot.slane %v1615_v33, %v1621_v30  ;;  %v1630_v36 = vcombine.high %v1622_v34, %v1622_v34  ;;  %v1638_v37 = vrot.slane %v1622_v34, %v1621_v30  ;;  %1862 = vst.sshfl [vmem:[%s342_s23] sm:$0x1 pattern:$0x73625140] %v1622_v34 }
 0x7fe   : > { %v1631_v38 = vcombine.high %v1629_v35, %v1629_v35  ;;  %v1645_v15 = vrot.slane %v1629_v35, %v1621_v30  ;;  %v1652_v39 = vrot.slane %v1630_v36, %v1621_v30  ;;  %v1660_v40 = vcombine.high %v1638_v37, %v1638_v37  ;;  %1863 = vst.sshfl [vmem:[%s342_s23 + $0x1] sm:$0x1 pattern:$0x73625140] %v1630_v36 }
 0x7ff   : > { %1864 = vst.sshfl [vmem:[%s342_s23 + $0x4] sm:$0x1 pattern:$0x73625140] %v1629_v35 }
 0x800   : > { %v1659_v41 = vrot.slane %v1631_v38, %v1621_v30  ;;  %v1661_v42 = vcombine.high %v1645_v15, %v1645_v15  ;;  %v1662_v43 = vcombine.high %v1652_v39, %v1652_v39  ;;  %1674 = vst [vmem:[%s342_s23 + $0x2] sm:$0x1] %v1660_v40  ;;  %1865 = vst.sshfl [vmem:[%s342_s23 + $0x5] sm:$0x1 pattern:$0x73625140] %v1631_v38 }
 0x802   : > { %v1663_v44 = vcombine.high %v1659_v41, %v1659_v41  ;;  %1675 = vst [vmem:[%s342_s23 + $0x3] sm:$0x1] %v1662_v43  ;;  %1678 = vst [vmem:[%s342_s23 + $0x6] sm:$0x1] %v1661_v42 }
 0x804   : > { %1679 = vst [vmem:[%s342_s23 + $0x7] sm:$0x1] %v1663_v44 }
 0x805   : > { %2348 = shalt.err (!%p2345_p13)
}
 0x806   : > { %s2349_s18 = scalar_lea.hbm %s2758_s17, 128  ;;  %s2353_s23 = scalar_lea.hbm %s2813_s8, 256 }
 0x807   : > { %p2350_p0 = scmp.ne.s32.totalorder %s2758_s17, %s2349_s18  ;;  %p2354_p9 = scmp.lt.u32.totalorder %s2758_s17, %s2813_s8 }
 0x808   : > { %p2355_p10 = scmp.lt.u32.totalorder %s2353_s23, %s2349_s18  ;;  %p2357_p1 = scmp.lt.u32.totalorder %s2349_s18, %s2758_s17 }
 0x809   : > { %p2351_p6 = pnand %p2350_p0, %p2826_p2 }
 0x80a   : > { %p2356_p12 = por %p2355_p10, %p2354_p9 }
 0x80b   : > { %p2352_p5 = pneg %p2351_p6 }
 0x80c   : > { %p2358_p3 = por %p2357_p1, %p2356_p12 }
 0x80e   : > { %p2359_p4 = pnand %p2358_p3, %p2352_p5 }
 0x810   : > { %2362 = shalt.err (!%p2359_p4)
}
 0x811   : > { %s2415_s22 = smov 16   ;;  %s2416_s21 = smov 1  }
 0x812   : > { %2111 = dma.vmem_to_hbm [thread:$0]  (%p2826_p2), %s2760_s25, 128, %s2758_s17, %s2764_s9, %s2415_s22, %s2415_s22, %s2416_s21  }
 0x813 PF: > { %p2128_p7 = scmp.ge.s32.totalorder %s2405_s30, 2  ;;  %s1709_s10 = sand.u32 1, %s2393_s27  }
 0x814   : > { %p2827_p8 = scmp.ne.s32.totalorder %s2818_s16, 0  ;;  %s1710_s12 = scalar_lea.sflag [#allocation4], %s1709_s10 }
 0x816   : > { %p2121_p11 = pnand %p2128_p7, %p2827_p8 }
 0x818   : > { %2388 = dma.done.wait (!%p2121_p11), %s1710_s12, 128  }
 0x819   : > { %2390 = vsyncadd (!%p2121_p11), %s1710_s12, 4294967168  ;;  %p20_p13 = scmp.ge.s32.totalorder %s2487_s11, 4   ;;  %s2828_s27 = smov %s2397_s28 }
 0x81a   : > { %s2829_s28 = smov %s2401_s29  ;;  %s2830_s29 = smov %s2498_s14 }
 0x81b   : > { %s2831_s30 = smov %s2487_s11  ;;  %22 = sbr.rel (!%p20_p13) target bundleno = 5 (0x5), region = 101 }
 0x822   :  { %1715 = vsyncpa [#allocation3], 1 }
 0x823   :  { %1717 = vsyncpa [#allocation3 + $0x1], 1 }
 0x824   :  { %1718 = vsyncpa [#allocation6], 1 }
 0x825   :  { %1719 = vsyncpa [#allocation4], 1 }
 0x826   :  { %1721 = vsyncpa [#allocation4 + $0x1], 1 }

// kernel: tpu_custom_call.1
= control target key start
LH: loop header
LB: loop body
LE: loop exit
PB: predicated region body
PF: predicated region fallthrough
CT: control target
= control target key end

     0   :  { %13 = vsyncpa [#allocation3], 0  ;;  %s2805_s0 = inlined_call_operand.vmem [shape: bf16[128,16], index: 0, kind: input, shape index: {}]   ;;  %s2806_s1 = inlined_call_operand.vmem [shape: bf16[2,64,64], index: 1, kind: input, shape index: {}]   ;;  %s2807_s2 = inlined_call_operand.vmem [shape: bf16[16,128], index: 2, kind: input, shape index: {}]   ;;  %s2808_s3 = inlined_call_operand.hbm [shape: f32[1,128], index: 3, kind: input, shape index: {}]   ;;  %s2809_s4 = inlined_call_operand.hbm [shape: bf16[2,256,128], index: 4, kind: input, shape index: {}]   ;;  %s2810_s5 = inlined_call_operand.vmem [shape: f32[2,1,128], index: 5, kind: input, shape index: {}]   ;;  %s2811_s6 = inlined_call_operand.vmem [shape: f32[8,128], index: 6, kind: input, shape index: {}]   ;;  %s2812_s7 = inlined_call_operand.vmem [shape: f32[8,128], index: 7, kind: input, shape index: {}]   ;;  %s2813_s8 = inlined_call_operand.hbm [shape: f32[16,1,128], index: 8, kind: output, shape index: {}]  }
   0x1   :  { %14 = vsyncpa [#allocation6], 0 }
   0x2   :  { %15 = vsyncpa [#allocation4], 0 }
   0x3   :  { %17 = vsyncpa [#allocation4 + $0x1], 0  ;;  %s2462_s27 = smov 0   ;;  %s2464_s28 = smov 0  }
   0x4   :  { %s2466_s29 = smov 0   ;;  %s2468_s30 = smov 0  }
   0x5 LB: > { %s2483_s9 = sadd.s32 4294967295, %s2405_s30   ;;  %s1790_s10 = sadd.s32 4294967294, %s2405_s30   ;;  %s2405_s30 = sphi %s2468_s30, %s2831_s30   ;;  %s2401_s29 = sphi %s2466_s29, %s2830_s29   ;;  %s2397_s28 = sphi %s2464_s28, %s2829_s28   ;;  %s2393_s27 = sphi %s2462_s27, %s2828_s27  }
   0x6   : > { %s2487_s11 = sadd.s32 1, %s2405_s30   ;;  %s208_s12 = sadd.s32 1, %s2401_s29 }
   0x7   : > { %s205_s13 = ssub.s32 %s2405_s30, %s2487_s11  ;;  %p218_p0 = scmp.ne.s32.totalorder %s2401_s29, %s2397_s28 }
   0x8   : > { %p206_p1 = scmp.eq.s32.totalorder %s205_s13, 0  ;;  %p219_p2 = scmp.eq.s32.totalorder %s2483_s9, 1 }
   0x9   : > { %p224_p3 = scmp.ne.s32.totalorder %s2397_s28, %s2393_s27  ;;  %p225_p4 = scmp.eq.s32.totalorder %s1790_s10, 1 }
   0xa   : > { %s2498_s14 = scalar_select %p206_p1, %s2401_s29, %s208_s12  }
   0xb   : > { %p2500_p5 = por %p219_p2, %p218_p0  ;;  %p2504_p6 = por %p225_p4, %p224_p3 }
   0xc   : > { %p1791_p7 = scmp.ge.s32.totalorder %s2405_s30, 1  ;;  %p232_p8 = scmp.lt.s32.totalorder %s2405_s30, 3 }
   0xd   : > { %s2817_s15 = scalar_select %p2500_p5, 1, 0 }
   0xe   : > { %s2818_s16 = scalar_select %p2504_p6, 1, 0 }
   0xf   : > { %p2814_p9 = scmp.eq.s32.totalorder %s2483_s9, 0  ;;  %p2511_p10 = pnand %p1791_p7, %p232_p8 }
  0x10   : > { %s2407_s18 = smov [#allocation2]   ;;  %s2408_s20 = smov [#allocation5]  }
  0x11   : > { %s2819_s17 = scalar_select %p2511_p10, 1, 0 }
  0x12   : > { %s248_s19 = sshll.u32 %s2407_s18, 4  ;;  %p2113_p11 = pneg %p2511_p10  ;;  %s249_s19 = int_to_ptr.vmem [resolvable:$true] %s248_s19 }
  0x13   : > { %s258_s21 = sshll.u32 %s2408_s20, 4  ;;  %s2279_s25 = scalar_lea.hbm %s2808_s3, 16  ;;  %s2523_s21 = int_to_ptr.vmem [resolvable:$true] %s258_s21 }
  0x14   : > { %p2519_p12 = pnand %p2814_p9, %p2113_p11  ;;  %p2280_p13 = scmp.ne.s32.totalorder %s2808_s3, %s2279_s25 }
  0x15   : > { %p2286_p3 = scmp.lt.u32.totalorder %s2279_s25, %s2808_s3 }
  0x16   : > { %p2281_p0 = pneg %p2519_p12 }
  0x18   : > { %p2282_p1 = pnand %p2281_p0, %p2280_p13 }
  0x1a   : > { %p2283_p2 = pneg %p2282_p1 }
  0x1c   : > { %p2288_p4 = pnand %p2286_p3, %p2283_p2 }
  0x1e   : > { %2291 = shalt.err (!%p2288_p4)
}
  0x1f   : > { %s2292_s18 = scalar_lea.vmem %s249_s19, 16  ;;  %s2299_s20 = scalar_lea.vmem %s249_s19, 32 }
  0x20   : > { %p2293_p7 = scmp.ne.s32.totalorder %s249_s19, %s2292_s18  ;;  %p2300_p9 = scmp.lt.s32.totalorder %s249_s19, %s249_s19 }
  0x21   : > { %p2301_p6 = scmp.lt.s32.totalorder %s2299_s20, %s2292_s18 }
  0x22   : > { %p2295_p8 = pnand %p2293_p7, %p2281_p0 }
  0x23   : > { %p2302_p5 = por %p2301_p6, %p2300_p9 }
  0x24   : > { %p2296_p11 = pneg %p2295_p8 }
  0x26   : > { %p2303_p10 = pnand %p2302_p5, %p2296_p11 }
  0x28   : > { %2306 = shalt.err (!%p2303_p10)
}
  0x29   : > { %2116 = dma.hbm_to_vmem [thread:$0]  (!%p2519_p12), %s2808_s3, 16, %s249_s19, [#allocation3]  }
  0x2a   : > { %s2307_s10 = scalar_lea.hbm %s2809_s4, 4096 }
  0x2b   : > { %p2308_p13 = scmp.ne.s32.totalorder %s2809_s4, %s2307_s10  ;;  %p2314_p9 = scmp.lt.u32.totalorder %s2307_s10, %s2809_s4 }
  0x2d   : > { %p2310_p6 = pnand %p2308_p13, %p2281_p0 }
  0x2f   : > { %p2311_p5 = pneg %p2310_p6 }
  0x31   : > { %p2316_p10 = pnand %p2314_p9, %p2311_p5 }
  0x33   : > { %2319 = shalt.err (!%p2316_p10)
}
  0x34   : > { %s2320_s19 = scalar_lea.vmem %s2523_s21, 4096  ;;  %p2328_p4 = scmp.lt.s32.totalorder %s2523_s21, %s2523_s21 }
  0x35   : > { %p2321_p1 = scmp.ne.s32.totalorder %s2523_s21, %s2320_s19  ;;  %p2329_p7 = scmp.lt.s32.totalorder %s2320_s19, %s2320_s19 }
  0x37   : > { %p2323_p2 = pnand %p2321_p1, %p2281_p0  ;;  %p2330_p8 = por %p2329_p7, %p2328_p4 }
  0x39   : > { %p2324_p3 = pneg %p2323_p2 }
  0x3b   : > { %p2331_p11 = pnand %p2330_p8, %p2324_p3 }
  0x3d   : > { %2334 = shalt.err (!%p2331_p11)
}
  0x3e   : > { %s2409_s23 = smov 64   ;;  %s2410_s24 = smov 4  }
  0x3f   : > { %2119 = dma.hbm_to_vmem [thread:$0]  (!%p2519_p12), %s2809_s4, 4096, %s2523_s21, [#allocation6], %s2409_s23, %s2409_s23, %s2410_s24  }
  0x40   : > { %p2821_p13 = scmp.ne.s32.totalorder %s2819_s17, 0 }
  0x41   : > { %p2822_p0 = scmp.eq.s32.totalorder (!%p2821_p13), %s2483_s9, 0 }
  0x42   : > { %300 = sbr.rel (%p2821_p13) target bundleno = 2067 (0x813), region = 52 }
  0x49   : > { %2380 = dma.done.wait (%p2822_p0), [#allocation3], 16   ;;  %p2823_p6 = pmov %p2822_p0 }
  0x4a   : > { %p2824_p5 = pmov %p2822_p0 }
  0x4b   : > { %2382 = vsyncadd (%p2823_p6), [#allocation3], 4294967280 }
  0x4c   : > { %2384 = dma.done.wait (%p2824_p5), [#allocation6], 4096   ;;  %p2825_p9 = pmov %p2822_p0 }
  0x4d   : > { %s1799_s22 = sshll.u32 %s2483_s9, 3  ;;  %v2170_v0 = vld [vmem:[%s2807_s2] sm:$0xff]   ;;  %vm399_vm0 = vcmask 130048   ;;  %p349_p12 = scmp.lt.s32.totalorder %s2483_s9, 1  ;;  %vm542_vm1 = vcmask 523264   ;;  %v2180_v30 = vld [vmem:[#allocation5 + $0x48] sm:$0xff]  }
  0x4e   : > { %2386 = vsyncadd (%p2825_p9), [#allocation6], 4294963200  ;;  %p344_p10 = scmp.lt.s32.totalorder %s1799_s22, 15  ;;  %1944 = vmatprep.subr.bf16.mxu1 %v2170_v0  ;;  %v1803_v7 = vld [vmem:[#allocation2] ss:$0 sm:$0xff]  ;;  %v2179_v27 = vld [vmem:[#allocation5 + $0x40] sm:$0xff]  }
  0x4f   : > { %1945 = vmatpush3.bf16.msra.mxu1 %v2170_v0  ;;  %s350_s20 = scalar_select %p349_p12, %s2483_s9, 1  ;;  %v2181_v31 = vld [vmem:[#allocation5 + $0x50] sm:$0xff]   ;;  %v2182_v33 = vld [vmem:[#allocation5 + $0x58] sm:$0xff]   ;;  %v2183_v34 = vld [vmem:[#allocation5 + $0x60] sm:$0xff]   ;;  %vm2412_vm2 = vmmov 0   ;;  %vm1521_vm3 = vcmask 1041409  }
  0x50   : > { %s2833_s22 = smov (!%p344_p10, %s1799_s22), 15  ;;  %v2184_v35 = vld [vmem:[#allocation5 + $0x68] sm:$0xff]   ;;  %v2185_v36 = vld [vmem:[#allocation5 + $0x70] sm:$0xff]   ;;  %v2186_v37 = vld [vmem:[#allocation5 + $0x78] sm:$0xff]   ;;  %vm1523_vm4 = vcmask 1042434   ;;  %vm1525_vm5 = vcmask 1043459  }
  0x51   : > { %s1800_s17 = sshll.u32 %s2833_s22, 2  ;;  %s1871_s19 = sshll.u32 %s350_s20, 5  ;;  %v2187_v38 = vld [vmem:[#allocation5] sm:$0xff]   ;;  %v2188_v45 = vld [vmem:[#allocation5 + $0x8] sm:$0xff]   ;;  %v2189_v48 = vld [vmem:[#allocation5 + $0x10] sm:$0xff]   ;;  %vm1527_vm6 = vcmask 1044484  }
  0x52   : > { %s347_s12 = scalar_lea.vmem %s2805_s0, %s1800_s17  ;;  %s2594_s25 = scalar_lea.vmem %s2806_s1, %s1871_s19  ;;  %v2190_v53 = vld [vmem:[#allocation5 + $0x18] sm:$0xff]   ;;  %v2191_v54 = vld [vmem:[#allocation5 + $0x20] sm:$0xff]   ;;  %v2192_v55 = vld [vmem:[#allocation5 + $0x28] sm:$0xff]   ;;  %vm1529_vm7 = vcmask 1045509   ;;  %vm1531_vm8 = vcmask 1046534   ;;  %vm1533_vm9 = vcmask 1047559  }
  0x53   : > { %v2171_v1 = vld [vmem:[%s347_s12] sm:$0xff]   ;;  %v2172_v2 = vld [vmem:[%s347_s12 + $0x8] sm:$0xff]   ;;  %v2173_v3 = vld [vmem:[%s347_s12 + $0x10] sm:$0xff]   ;;  %vm1535_vm10 = vcmask 64512   ;;  %s340_s20 = sand.u32 1, %s2397_s28   ;;  %s1872_s24 = sshll.u32 %s2483_s9, 7 }
  0x54   : > { %1946 = vmatprep.mubr.msk.bf16.mxu1 %vm399_vm0, %v2171_v1  ;;  %v2174_v4 = vld [vmem:[%s347_s12 + $0x18] sm:$0xff]   ;;  %v2175_v5 = vld [vmem:[%s2594_s25] sm:$0xff]   ;;  %v2639_v28 = vld [vmem:[%s2594_s25 + $0x8] sm:$0xff]   ;;  %s1798_s19 = sshll.u32 %s340_s20, 3  ;;  %s2758_s17 = scalar_lea.hbm %s2813_s8, %s1872_s24 }
  0x55   : > { %1947 = vmatmul.mubr.msk.bf16.vlgmr.msra.gmra.mrb[0].mxu1 %vm399_vm0, %v2172_v2  ;;  %1962 = vmatprep.mubr.msk.bf16.mxu0 %vm542_vm1, %v2175_v5  ;;  %v2643_v29 = vld [vmem:[%s2594_s25 + $0x10] sm:$0xff]   ;;  %v2650_v32 = vld [vmem:[%s2594_s25 + $0x18] sm:$0xff]   ;;  %v1837_v58 = vld [vmem:[%s2810_s5] ss:$0 sm:$0xff]  ;;  %s342_s23 = scalar_lea.vmem [#allocation7], %s1798_s19  ;;  %s2764_s9 = scalar_lea.sflag [#allocation4], %s340_s20 }
  0x56   : > { %1950 = vmatprep.mubr.msk.bf16.mxu1 %vm399_vm0, %v2173_v3  ;;  %v2193_v56 = vld [vmem:[#allocation5 + $0x30] sm:$0xff]   ;;  %v2194_v57 = vld [vmem:[#allocation5 + $0x38] sm:$0xff]   ;;  %s1694_s25 = sshll.u32 %s342_s23, 4  ;;  %p2826_p2 = scmp.ne.s32.totalorder %s2817_s15, 0  ;;  %s2760_s25 = int_to_ptr.vmem [resolvable:$true] %s1694_s25 }
  0x57   : > { %s2335_s21 = scalar_lea.vmem %s2760_s25, 128  ;;  %s2414_s10 = smov [#allocation7]  }
  0x58   : > { %p2336_p1 = scmp.ne.s32.totalorder %s2760_s25, %s2335_s21  ;;  %s2339_s12 = sshll.u32 %s2414_s10, 4  ;;  %s2340_s12 = int_to_ptr.vmem [resolvable:$false] %s2339_s12 }
  0x59   : > { %s2341_s13 = scalar_lea.vmem %s2340_s12, 256  ;;  %p2342_p7 = scmp.lt.s32.totalorder %s2760_s25, %s2340_s12 }
  0x5a   : > { %p2337_p3 = pnand %p2336_p1, %p2826_p2  ;;  %p2343_p8 = scmp.lt.s32.totalorder %s2341_s13, %s2335_s21 }
  0x5c   : > { %p2338_p4 = pneg %p2337_p3  ;;  %p2344_p11 = por %p2343_p8, %p2342_p7 }
  0x5d   : > { %1951 = vmatmul.mubr.msk.bf16.gmra.mrb[4].mxu1 %vm399_vm0, %v2174_v4 }
  0x5e   : > { %2026 = vmatprep.mubr.msk.bf16.mxu1 %vm542_vm1, %v2175_v5  ;;  %p2345_p13 = pnand %p2344_p11, %p2338_p4 }
 0x128   : > { %v1948_v6 = vpop.f32.mrb[0].mxu1 }
 0x129   : > { %v446_v8 = vpop.f32.mrb[1].mxu1  ;;  %v2605_v14 = vadd.f32 %v1948_v6, %v1803_v7 }
 0x12a   : > { %v1949_v9 = vpop.f32.mrb[2].mxu1  ;;  %v2599_v11 = vadd.f32 %v1803_v7, %v446_v8 }
 0x12b   : > { %v449_v10 = vpop.f32.mrb[3].mxu1  ;;  %v2601_v12 = vadd.f32 %v1949_v9, %v1803_v7 }
 0x12c   : > { %v2603_v13 = vadd.f32 %v1803_v7, %v449_v10 }
 0x12d   : > { %v2613_v16 = vpack.c.bf16 %v2601_v12, %v2605_v14 }
 0x12e   : > { %v2609_v15 = vpack.c.bf16 %v2603_v13, %v2599_v11 }
 0x130   : > { %v1952_v17 = vpop.f32.mrb[4].mxu1  ;;  %1954 = vmatprep.subr.bf16.mxu0 %v2609_v15 }
 0x131   : > { %v462_v18 = vpop.f32.mrb[5].mxu1  ;;  %1955 = vmatpush3.bf16.msra.mxu0 %v2609_v15  ;;  %v2625_v24 = vadd.f32 %v1952_v17, %v1803_v7 }
 0x132   : > { %v1953_v19 = vpop.f32.mrb[6].mxu1  ;;  %1956 = vmatprep.subr.bf16.mxu0 %v2613_v16  ;;  %v2618_v21 = vadd.f32 %v1803_v7, %v462_v18 }
 0x133   : > { %v465_v20 = vpop.f32.mrb[7].mxu1  ;;  %v2620_v22 = vadd.f32 %v1953_v19, %v1803_v7 }
 0x134   : > { %v2622_v23 = vadd.f32 %v1803_v7, %v465_v20 }
 0x135   : > { %1957 = vmatpush3.bf16.msra.mxu0 %v2613_v16  ;;  %v2633_v26 = vpack.c.bf16 %v2620_v22, %v2625_v24 }
 0x136   : > { %v2629_v25 = vpack.c.bf16 %v2622_v23, %v2618_v21 }
 0x138   : > { %1958 = vmatprep.subr.bf16.mxu0 %v2629_v25 }
 0x139   : > { %1959 = vmatpush3.bf16.msra.mxu0 %v2629_v25 }
 0x13a   : > { %1960 = vmatprep.subr.bf16.mxu0 %v2633_v26 }
 0x13d   : > { %1961 = vmatpush3.bf16.msra.mxu0 %v2633_v26 }
 0x13e   : > { %1970 = vmatprep.subr.bf16.mxu0 %v2179_v27 }
 0x140   : > { %1963 = vmatmul.mubr.msk.bf16.vlgmr.msra.gmra.mrb[0].mxu0 %vm542_vm1, %v2639_v28 }
 0x141   : > { %1966 = vmatprep.mubr.msk.bf16.mxu0 %vm542_vm1, %v2643_v29  ;;  %1971 = vmatpush3.bf16.msra.mxu0 %v2179_v27 }
 0x142   : > { %1972 = vmatprep.subr.bf16.mxu0 %v2180_v30 }
 0x145   : > { %1973 = vmatpush3.bf16.msra.mxu0 %v2180_v30 }
 0x146   : > { %1974 = vmatprep.subr.bf16.mxu0 %v2181_v31 }
 0x148   : > { %1967 = vmatmul.mubr.msk.bf16.gmra.mrb[4].mxu0 %vm542_vm1, %v2650_v32 }
 0x149   : > { %1975 = vmatpush3.bf16.msra.mxu0 %v2181_v31 }
 0x14a   : > { %1976 = vmatprep.subr.bf16.mxu0 %v2182_v33 }
 0x14d   : > { %1977 = vmatpush3.bf16.msra.mxu0 %v2182_v33 }
 0x14e   : > { %1978 = vmatprep.subr.bf16.mxu0 %v2183_v34 }
 0x151   : > { %1979 = vmatpush3.bf16.msra.mxu0 %v2183_v34 }
 0x152   : > { %1980 = vmatprep.subr.bf16.mxu0 %v2184_v35 }
 0x155   : > { %1981 = vmatpush3.bf16.msra.mxu0 %v2184_v35 }
 0x156   : > { %1982 = vmatprep.subr.bf16.mxu0 %v2185_v36 }
 0x159   : > { %1983 = vmatpush3.bf16.msra.mxu0 %v2185_v36 }
 0x15a   : > { %1984 = vmatprep.subr.bf16.mxu0 %v2186_v37 }
 0x15d   : > { %1985 = vmatpush3.bf16.msra.mxu0 %v2186_v37 }
 0x15e   : > { %1994 = vmatprep.subr.bf16.mxu0 %v2187_v38 }
 0x213   : > { %v1964_v39 = vpop.f32.mrb[0].mxu0 }
 0x214   : > { %v589_v40 = vpop.f32.mrb[1].mxu0 }
 0x215   : > { %v1965_v41 = vpop.f32.mrb[2].mxu0 }
 0x216   : > { %v621_v42 = vpack.c.bf16 %v1965_v41, %v1964_v39  ;;  %v592_v43 = vpop.f32.mrb[3].mxu0 }
 0x217   : > { %v620_v44 = vpack.c.bf16 %v592_v43, %v589_v40 }
 0x219   : > { %1986 = vmatprep.mubr.bf16.mxu0 %v620_v44 }
 0x21a   : > { %1987 = vmatmul.mubr.bf16.vlgmr.msra.gmra.mrb[8].mxu0 %v621_v42 }
 0x21b   : > { %1995 = vmatpush3.bf16.msra.mxu0 %v2187_v38  ;;  %v1968_v46 = vpop.f32.mrb[4].mxu0 }
 0x21c   : > { %v605_v47 = vpop.f32.mrb[5].mxu0  ;;  %1996 = vmatprep.subr.bf16.mxu0 %v2188_v45 }
 0x21d   : > { %v1969_v49 = vpop.f32.mrb[6].mxu0 }
 0x21e   : > { %v623_v50 = vpack.c.bf16 %v1969_v49, %v1968_v46  ;;  %v608_v51 = vpop.f32.mrb[7].mxu0 }
 0x21f   : > { %v622_v52 = vpack.c.bf16 %v608_v51, %v605_v47  ;;  %1997 = vmatpush3.bf16.msra.mxu0 %v2188_v45 }
 0x220   : > { %1998 = vmatprep.subr.bf16.mxu0 %v2189_v48 }
 0x221   : > { %1990 = vmatprep.mubr.bf16.mxu0 %v622_v52 }
 0x222   : > { %1991 = vmatmul.mubr.bf16.gmra.mrb[12].mxu0 %v623_v50 }
 0x223   : > { %1999 = vmatpush3.bf16.msra.mxu0 %v2189_v48  ;;  %2010 = vmatprep.mubr.bf16.mxu0 %v2609_v15 }
 0x224   : > { %2000 = vmatprep.subr.bf16.mxu0 %v2190_v53 }
 0x227   : > { %2001 = vmatpush3.bf16.msra.mxu0 %v2190_v53 }
 0x228   : > { %2002 = vmatprep.subr.bf16.mxu0 %v2191_v54 }
 0x22b   : > { %2003 = vmatpush3.bf16.msra.mxu0 %v2191_v54 }
 0x22c   : > { %2004 = vmatprep.subr.bf16.mxu0 %v2192_v55 }
 0x22f   : > { %2005 = vmatpush3.bf16.msra.mxu0 %v2192_v55 }
 0x230   : > { %2006 = vmatprep.subr.bf16.mxu0 %v2193_v56 }
 0x233   : > { %2007 = vmatpush3.bf16.msra.mxu0 %v2193_v56 }
 0x234   : > { %2008 = vmatprep.subr.bf16.mxu0 %v2194_v57 }
 0x237   : > { %2009 = vmatpush3.bf16.msra.mxu0 %v2194_v57 }
 0x23a   : > { %2011 = vmatmul.mubr.bf16.vlgmr.msra.gmra.mrb[8].mxu0 %v2613_v16 }
 0x23b   : > { %2014 = vmatprep.mubr.bf16.mxu0 %v2629_v25 }
 0x242   : > { %2015 = vmatmul.mubr.bf16.gmra.mrb[12].mxu0 %v2633_v26 }
 0x30d   : > { %v2012_v59 = vpop.f32.mrb[8].mxu0 }
 0x30e   : > { %v858_v60 = vadd.f32 %v2012_v59, %v1837_v58  ;;  %v819_v61 = vpop.f32.mrb[9].mxu0 }
 0x30f   : > { %v856_v62 = vadd.f32 %v1837_v58, %v819_v61  ;;  %v2013_v63 = vpop.f32.mrb[10].mxu0 }
 0x310   : > { %v859_v0 = vadd.f32 %v2013_v63, %v1837_v58  ;;  %v822_v1 = vpop.f32.mrb[11].mxu0  ;;  %v866_v2 = vmul.f32 %v858_v60, %v858_v60 }
 0x311   : > { %v857_v3 = vadd.f32 %v1837_v58, %v822_v1  ;;  %v864_v4 = vmul.f32 %v856_v62, %v856_v62 }
 0x312   : > { %876 = vadd.xlane.f32.xlu1 %v866_v2  ;;  %v867_v5 = vmul.f32 %v859_v0, %v859_v0 }
 0x313   : > { %872 = vadd.xlane.f32.xlu0 %v864_v4  ;;  %v865_v7 = vmul.f32 %v857_v3, %v857_v3 }
 0x315   : > { %v2016_v6 = vpop.f32.mrb[12].mxu0 }
 0x316   : > { %878 = vadd.xlane.f32.xlu1 %v867_v5  ;;  %v835_v8 = vpop.f32.mrb[13].mxu0  ;;  %v862_v16 = vadd.f32 %v2016_v6, %v1837_v58 }
 0x317   : > { %v860_v9 = vadd.f32 %v1837_v58, %v835_v8  ;;  %874 = vadd.xlane.f32.xlu0 %v865_v7  ;;  %v2017_v10 = vpop.f32.mrb[14].mxu0 }
 0x318   : > { %v838_v15 = vpop.f32.mrb[15].mxu0  ;;  %v2661_v19 = vadd.f32 %v2017_v10, %v1837_v58  ;;  %v870_v25 = vmul.f32 %v862_v16, %v862_v16 }
 0x319   : > { %v861_v17 = vadd.f32 %v1837_v58, %v838_v15  ;;  %v868_v18 = vmul.f32 %v860_v9, %v860_v9 }
 0x31a   : > { %v871_v26 = vmul.f32 %v2661_v19, %v2661_v19 }
 0x31b   : > { %880 = vadd.xlane.f32.xlu0 %v868_v18  ;;  %v869_v20 = vmul.f32 %v861_v17, %v861_v17  ;;  %v2199_v18 = vld [vmem:[#allocation5 + $0xe0] sm:$0xff]  }
 0x31d   : > { %882 = vadd.xlane.f32.xlu1 %v869_v20  ;;  %v2203_v20 = vld [vmem:[#allocation5 + $0x80] sm:$0xff]  }
 0x31f   : > { %884 = vadd.xlane.f32.xlu0 %v870_v25 }
 0x321   : > { %886 = vadd.xlane.f32.xlu1 %v871_v26 }
 0x39f   : > { %v877_v27 = vpop.xlane.xlu1 %876 }
 0x3a0   : > { %v890_v30 = vmax.f32 %v877_v27, 1e-24  ;;  %v873_v31 = vpop.xlane.xlu0 %872 }
 0x3a1   : > { %v888_v33 = vmax.f32 %v873_v31, 1e-24 }
 0x3a2   : > { %2211 = vrsqrt.f32 %v890_v30 }
 0x3a3   : > { %2213 = vrsqrt.f32 %v888_v33  ;;  %v879_v34 = vpop.xlane.xlu1 %878  ;;  %v2204_v33 = vld [vmem:[#allocation5 + $0x88] sm:$0xff]  }
 0x3a4   : > { %v891_v35 = vmax.f32 %v879_v34, 1e-24  ;;  %v875_v36 = vpop.xlane.xlu0 %874 }
 0x3a5   : > { %v889_v37 = vmax.f32 %v875_v36, 1e-24  ;;  %v2205_v36 = vld [vmem:[#allocation5 + $0x90] sm:$0xff]  }
 0x3a6   : > { %2215 = vrsqrt.f32 %v891_v35 }
 0x3a7   : > { %2217 = vrsqrt.f32 %v889_v37 }
 0x3a8   : > { %v881_v38 = vpop.xlane.xlu0 %880 }
 0x3a9   : > { %v892_v39 = vmax.f32 %v881_v38, 1e-24 }
 0x3aa   : > { %v883_v40 = vpop.xlane.xlu1 %882 }
 0x3ab   : > { %2219 = vrsqrt.f32 %v892_v39  ;;  %v893_v41 = vmax.f32 %v883_v40, 1e-24 }
 0x3ac   : > { %v2212_v42 = vpop.eup %2211  ;;  %v885_v43 = vpop.xlane.xlu0 %884 }
 0x3ad   : > { %v2214_v44 = vpop.eup %2213  ;;  %2221 = vrsqrt.f32 %v893_v41  ;;  %v894_v45 = vmax.f32 %v885_v43, 1e-24  ;;  %v906_v50 = vmul.f32 %v2212_v42, %v858_v60  ;;  %v2206_v41 = vld [vmem:[#allocation5 + $0x98] sm:$0xff]   ;;  %v2207_v42 = vld [vmem:[#allocation5 + $0xa0] sm:$0xff]   ;;  %v2208_v43 = vld [vmem:[#allocation5 + $0xa8] sm:$0xff]  }
 0x3ae   : > { %v887_v46 = vpop.xlane.xlu1 %886  ;;  %v904_v47 = vmul.f32 %v2214_v44, %v856_v62  ;;  %v2209_v44 = vld [vmem:[#allocation5 + $0xb0] sm:$0xff]  }
 0x3af   : > { %2223 = vrsqrt.f32 %v894_v45  ;;  %v895_v48 = vmax.f32 %v887_v46, 1e-24  ;;  %v914_v57 = vmax.f32 %v906_v50, 0.0  ;;  %v2210_v45 = vld [vmem:[#allocation5 + $0xb8] sm:$0xff]  }
 0x3b0   : > { %v2216_v49 = vpop.eup %2215  ;;  %v912_v54 = vmax.f32 %v904_v47, 0.0  ;;  %v1859_v46 = vld [vmem:[%s2810_s5 + $0x1] ss:$0 sm:$0xff] }
 0x3b1   : > { %v2218_v51 = vpop.eup %2217  ;;  %2225 = vrsqrt.f32 %v895_v48  ;;  %v907_v52 = vmul.f32 %v2216_v49, %v859_v0  ;;  %v2679_v1 = vadd.f32 %v914_v57, %v2605_v14 }
 0x3b2   : > { %v905_v53 = vmul.f32 %v2218_v51, %v857_v3  ;;  %v2666_v59 = vadd.f32 %v912_v54, %v2599_v11 }
 0x3b3   : > { %v915_v55 = vmax.f32 %v907_v52, 0.0 }
 0x3b4   : > { %v913_v56 = vmax.f32 %v905_v53, 0.0 }
 0x3b5   : > { %v2220_v58 = vpop.eup %2219  ;;  %v2672_v62 = vadd.f32 %v915_v55, %v2601_v12 }
 0x3b6   : > { %v2669_v61 = vadd.f32 %v913_v56, %v2603_v13  ;;  %v908_v63 = vmul.f32 %v2220_v58, %v860_v9 }
 0x3b7   : > { %v2222_v60 = vpop.eup %2221  ;;  %v2684_v11 = vpack.c.bf16 %v2672_v62, %v2679_v1 }
 0x3b8   : > { %v2676_v0 = vpack.c.bf16 %v2669_v61, %v2666_v59  ;;  %v909_v2 = vmul.f32 %v2222_v60, %v861_v17  ;;  %v916_v3 = vmax.f32 %v908_v63, 0.0  ;;  %v2196_v17 = vld [vmem:[#allocation5 + $0xc8] sm:$0xff]  }
 0x3b9   : > { %v2224_v4 = vpop.eup %2223 }
 0x3ba   : > { %2018 = vmatprep.subr.bf16.mxu1 %v2676_v0  ;;  %v917_v12 = vmax.f32 %v909_v2, 0.0  ;;  %v910_v13 = vmul.f32 %v2224_v4, %v862_v16  ;;  %v2689_v6 = vadd.f32 %v916_v3, %v2618_v21  ;;  %v2195_v16 = vld [vmem:[#allocation5 + $0xc0] sm:$0xff]  }
 0x3bb   : > { %v2226_v5 = vpop.eup %2225  ;;  %2019 = vmatpush3.bf16.msra.mxu1 %v2676_v0 }
 0x3bc   : > { %2020 = vmatprep.subr.bf16.mxu1 %v2684_v11  ;;  %v2692_v14 = vadd.f32 %v917_v12, %v2622_v23  ;;  %v911_v7 = vmul.f32 %v2226_v5, %v2661_v19  ;;  %v918_v8 = vmax.f32 %v910_v13, 0.0  ;;  %v2200_v19 = vld [vmem:[#allocation5 + $0xe8] sm:$0xff]  }
 0x3be   : > { %v2697_v9 = vpack.c.bf16 %v2692_v14, %v2689_v6  ;;  %v919_v10 = vmax.f32 %v911_v7, 0.0  ;;  %v2702_v15 = vadd.f32 %v918_v8, %v2625_v24  ;;  %v2198_v24 = vld [vmem:[#allocation5 + $0xd8] sm:$0xff]  }
 0x3bf   : > { %2021 = vmatpush3.bf16.msra.mxu1 %v2684_v11 }
 0x3c0   : > { %2022 = vmatprep.subr.bf16.mxu1 %v2697_v9  ;;  %v2705_v21 = vadd.f32 %v919_v10, %v2620_v22  ;;  %v2197_v22 = vld [vmem:[#allocation5 + $0xd0] sm:$0xff]  }
 0x3c2   : > { %v2709_v23 = vpack.c.bf16 %v2705_v21, %v2702_v15 }
 0x3c3   : > { %2023 = vmatpush3.bf16.msra.mxu1 %v2697_v9 }
 0x3c4   : > { %2024 = vmatprep.subr.bf16.mxu1 %v2709_v23 }
 0x3c7   : > { %2025 = vmatpush3.bf16.msra.mxu1 %v2709_v23 }
 0x3c8   : > { %2034 = vmatprep.subr.bf16.mxu1 %v2195_v16 }
 0x3ca   : > { %2027 = vmatmul.mubr.msk.bf16.vlgmr.msra.gmra.mrb[8].mxu1 %vm542_vm1, %v2639_v28  ;;  %v2201_v28 = vld [vmem:[#allocation5 + $0xf0] sm:$0xff]  }
 0x3cb   : > { %2030 = vmatprep.mubr.msk.bf16.mxu1 %vm542_vm1, %v2643_v29  ;;  %2035 = vmatpush3.bf16.msra.mxu1 %v2195_v16  ;;  %v2202_v29 = vld [vmem:[#allocation5 + $0xf8] sm:$0xff]  }
 0x3cc   : > { %2036 = vmatprep.subr.bf16.mxu1 %v2196_v17 }
 0x3cf   : > { %2037 = vmatpush3.bf16.msra.mxu1 %v2196_v17 }
 0x3d0   : > { %2038 = vmatprep.subr.bf16.mxu1 %v2197_v22 }
 0x3d2   : > { %2031 = vmatmul.mubr.msk.bf16.gmra.mrb[12].mxu1 %vm542_vm1, %v2650_v32 }
 0x3d3   : > { %2039 = vmatpush3.bf16.msra.mxu1 %v2197_v22 }
 0x3d4   : > { %2040 = vmatprep.subr.bf16.mxu1 %v2198_v24 }
 0x3d7   : > { %2041 = vmatpush3.bf16.msra.mxu1 %v2198_v24 }
 0x3d8   : > { %2042 = vmatprep.subr.bf16.mxu1 %v2199_v18 }
 0x3db   : > { %2043 = vmatpush3.bf16.msra.mxu1 %v2199_v18 }
 0x3dc   : > { %2044 = vmatprep.subr.bf16.mxu1 %v2200_v19 }
 0x3df   : > { %2045 = vmatpush3.bf16.msra.mxu1 %v2200_v19 }
 0x3e0   : > { %2046 = vmatprep.subr.bf16.mxu1 %v2201_v28 }
 0x3e3   : > { %2047 = vmatpush3.bf16.msra.mxu1 %v2201_v28 }
 0x3e4   : > { %2048 = vmatprep.subr.bf16.mxu1 %v2202_v29 }
 0x3e7   : > { %2049 = vmatpush3.bf16.msra.mxu1 %v2202_v29 }
 0x3e8   : > { %2058 = vmatprep.subr.bf16.mxu1 %v2203_v20 }
 0x49d   : > { %v2028_v25 = vpop.f32.mrb[8].mxu1 }
 0x49e   : > { %v1001_v26 = vpop.f32.mrb[9].mxu1 }
 0x49f   : > { %v2029_v32 = vpop.f32.mrb[10].mxu1 }
 0x4a0   : > { %v1033_v27 = vpack.c.bf16 %v2029_v32, %v2028_v25  ;;  %v1004_v30 = vpop.f32.mrb[11].mxu1 }
 0x4a1   : > { %v1032_v31 = vpack.c.bf16 %v1004_v30, %v1001_v26 }
 0x4a3   : > { %2050 = vmatprep.mubr.bf16.mxu1 %v1032_v31 }
 0x4a4   : > { %2051 = vmatmul.mubr.bf16.vlgmr.msra.gmra.mrb[16].mxu1 %v1033_v27 }
 0x4a5   : > { %2059 = vmatpush3.bf16.msra.mxu1 %v2203_v20  ;;  %v2032_v34 = vpop.f32.mrb[12].mxu1 }
 0x4a6   : > { %v1017_v35 = vpop.f32.mrb[13].mxu1  ;;  %2060 = vmatprep.subr.bf16.mxu1 %v2204_v33 }
 0x4a7   : > { %v2033_v37 = vpop.f32.mrb[14].mxu1 }
 0x4a8   : > { %v1035_v38 = vpack.c.bf16 %v2033_v37, %v2032_v34  ;;  %v1020_v39 = vpop.f32.mrb[15].mxu1 }
 0x4a9   : > { %v1034_v40 = vpack.c.bf16 %v1020_v39, %v1017_v35  ;;  %2061 = vmatpush3.bf16.msra.mxu1 %v2204_v33 }
 0x4aa   : > { %2062 = vmatprep.subr.bf16.mxu1 %v2205_v36 }
 0x4ab   : > { %2054 = vmatprep.mubr.bf16.mxu1 %v1034_v40 }
 0x4ac   : > { %2055 = vmatmul.mubr.bf16.gmra.mrb[20].mxu1 %v1035_v38 }
 0x4ad   : > { %2063 = vmatpush3.bf16.msra.mxu1 %v2205_v36  ;;  %2074 = vmatprep.mubr.bf16.mxu1 %v2676_v0 }
 0x4ae   : > { %2064 = vmatprep.subr.bf16.mxu1 %v2206_v41 }
 0x4b1   : > { %2065 = vmatpush3.bf16.msra.mxu1 %v2206_v41 }
 0x4b2   : > { %2066 = vmatprep.subr.bf16.mxu1 %v2207_v42 }
 0x4b5   : > { %2067 = vmatpush3.bf16.msra.mxu1 %v2207_v42 }
 0x4b6   : > { %2068 = vmatprep.subr.bf16.mxu1 %v2208_v43 }
 0x4b9   : > { %2069 = vmatpush3.bf16.msra.mxu1 %v2208_v43 }
 0x4ba   : > { %2070 = vmatprep.subr.bf16.mxu1 %v2209_v44 }
 0x4bd   : > { %2071 = vmatpush3.bf16.msra.mxu1 %v2209_v44 }
 0x4be   : > { %2072 = vmatprep.subr.bf16.mxu1 %v2210_v45 }
 0x4c1   : > { %2073 = vmatpush3.bf16.msra.mxu1 %v2210_v45 }
 0x4c4   : > { %2075 = vmatmul.mubr.bf16.vlgmr.msra.gmra.mrb[16].mxu1 %v2684_v11 }
 0x4c5   : > { %2078 = vmatprep.mubr.bf16.mxu1 %v2697_v9 }
 0x4cc   : > { %2079 = vmatmul.mubr.bf16.gmra.mrb[20].mxu1 %v2709_v23 }
 0x597   : > { %v2076_v47 = vpop.f32.mrb[16].mxu1 }
 0x598   : > { %v1270_v48 = vadd.f32 %v2076_v47, %v1859_v46  ;;  %v1231_v49 = vpop.f32.mrb[17].mxu1 }
 0x599   : > { %v2077_v50 = vpop.f32.mrb[18].mxu1  ;;  %v1268_v51 = vadd.f32 %v1859_v46, %v1231_v49 }
 0x59a   : > { %v1271_v52 = vadd.f32 %v2077_v50, %v1859_v46  ;;  %v1234_v53 = vpop.f32.mrb[19].mxu1  ;;  %v1278_v54 = vmul.f32 %v1270_v48, %v1270_v48 }
 0x59b   : > { %v1269_v55 = vadd.f32 %v1859_v46, %v1234_v53  ;;  %v1276_v57 = vmul.f32 %v1268_v51, %v1268_v51 }
 0x59c   : > { %1288 = vadd.xlane.f32.xlu0 %v1278_v54  ;;  %v1279_v56 = vmul.f32 %v1271_v52, %v1271_v52 }
 0x59d   : > { %v1277_v60 = vmul.f32 %v1269_v55, %v1269_v55 }
 0x59e   : > { %1290 = vadd.xlane.f32.xlu1 %v1279_v56 }
 0x59f   : > { %v2080_v58 = vpop.f32.mrb[20].mxu1 }
 0x5a0   : > { %1284 = vadd.xlane.f32.xlu0 %v1276_v57  ;;  %v1247_v63 = vpop.f32.mrb[21].mxu1  ;;  %v2727_v4 = vadd.f32 %v2080_v58, %v1859_v46 }
 0x5a1   : > { %v1272_v0 = vadd.f32 %v1859_v46, %v1247_v63  ;;  %v2081_v2 = vpop.f32.mrb[22].mxu1 }
 0x5a2   : > { %1286 = vadd.xlane.f32.xlu1 %v1277_v60  ;;  %v1250_v3 = vpop.f32.mrb[23].mxu1  ;;  %v2729_v13 = vadd.f32 %v2081_v2, %v1859_v46  ;;  %v1282_v7 = vmul.f32 %v2727_v4, %v2727_v4 }
 0x5a3   : > { %v1273_v11 = vadd.f32 %v1859_v46, %v1250_v3  ;;  %v1280_v12 = vmul.f32 %v1272_v0, %v1272_v0 }
 0x5a4   : > { %v1283_v8 = vmul.f32 %v2729_v13, %v2729_v13 }
 0x5a5   : > { %1292 = vadd.xlane.f32.xlu0 %v1280_v12  ;;  %v1281_v5 = vmul.f32 %v1273_v11, %v1273_v11 }
 0x5a7   : > { %1294 = vadd.xlane.f32.xlu1 %v1281_v5 }
 0x5a9   : > { %1296 = vadd.xlane.f32.xlu0 %v1282_v7 }
 0x5ab   : > { %1298 = vadd.xlane.f32.xlu1 %v1283_v8 }
 0x629   : > { %v1289_v9 = vpop.xlane.xlu0 %1288 }
 0x62a   : > { %v1302_v10 = vmax.f32 %v1289_v9, 1e-24 }
 0x62b   : > { %v1291_v23 = vpop.xlane.xlu1 %1290 }
 0x62c   : > { %2227 = vrsqrt.f32 %v1302_v10  ;;  %v1303_v16 = vmax.f32 %v1291_v23, 1e-24 }
 0x62d   : > { %v1285_v17 = vpop.xlane.xlu0 %1284 }
 0x62e   : > { %2229 = vrsqrt.f32 %v1303_v16  ;;  %v1300_v22 = vmax.f32 %v1285_v17, 1e-24 }
 0x62f   : > { %v1287_v24 = vpop.xlane.xlu1 %1286 }
 0x630   : > { %2231 = vrsqrt.f32 %v1300_v22  ;;  %v1301_v18 = vmax.f32 %v1287_v24, 1e-24 }
 0x632   : > { %2233 = vrsqrt.f32 %v1301_v18  ;;  %v1293_v19 = vpop.xlane.xlu0 %1292 }
 0x633   : > { %v1304_v28 = vmax.f32 %v1293_v19, 1e-24 }
 0x634   : > { %v1295_v29 = vpop.xlane.xlu1 %1294 }
 0x635   : > { %2235 = vrsqrt.f32 %v1304_v28  ;;  %v1305_v20 = vmax.f32 %v1295_v29, 1e-24 }
 0x636   : > { %v2228_v25 = vpop.eup %2227  ;;  %v1297_v26 = vpop.xlane.xlu0 %1296 }
 0x637   : > { %v1318_v32 = vmul.f32 %v2228_v25, %v1270_v48  ;;  %2237 = vrsqrt.f32 %v1305_v20  ;;  %v1306_v27 = vmax.f32 %v1297_v26, 1e-24 }
 0x638   : > { %v2230_v30 = vpop.eup %2229  ;;  %v1299_v31 = vpop.xlane.xlu1 %1298 }
 0x639   : > { %v1319_v33 = vmul.f32 %v2230_v30, %v1271_v52  ;;  %2239 = vrsqrt.f32 %v1306_v27  ;;  %v1307_v34 = vmax.f32 %v1299_v31, 1e-24  ;;  %v1326_v35 = vmax.f32 %v1318_v32, 0.0 }
 0x63a   : > { %v2232_v36 = vpop.eup %2231 }
 0x63b   : > { %v1316_v37 = vmul.f32 %v2232_v36, %v1268_v51  ;;  %2241 = vrsqrt.f32 %v1307_v34  ;;  %v1334_v38 = vadd.f32 %v1326_v35, %v2679_v1  ;;  %v1327_v39 = vmax.f32 %v1319_v33, 0.0 }
 0x63c   : > { %v2234_v40 = vpop.eup %2233 }
 0x63d   : > { %v1317_v41 = vmul.f32 %v2234_v40, %v1269_v55  ;;  %v1352_v42 = vrot.slane %v1334_v38, 4  ;;  %v1335_v43 = vadd.f32 %v1327_v39, %v2672_v62  ;;  %v1324_v44 = vmax.f32 %v1316_v37, 0.0 }
 0x63f   : > { %v2236_v45 = vpop.eup %2235  ;;  %v1353_v46 = vadd.f32 %v1352_v42, %v1334_v38  ;;  %v1358_v47 = vrot.slane %v1335_v43, 4  ;;  %v1332_v48 = vadd.f32 %v1324_v44, %v2666_v59  ;;  %v1325_v49 = vmax.f32 %v1317_v41, 0.0 }
 0x640   : > { %v1320_v50 = vmul.f32 %v2236_v45, %v1272_v0 }
 0x641   : > { %v2238_v52 = vpop.eup %2237  ;;  %v1354_v53 = vrot.slane %v1353_v46, 2  ;;  %v1359_v51 = vadd.f32 %v1358_v47, %v1335_v43  ;;  %v1340_v54 = vrot.slane %v1332_v48, 4  ;;  %v1333_v1 = vadd.f32 %v1325_v49, %v2669_v61 }
 0x642   : > { %v1321_v56 = vmul.f32 %v2238_v52, %v1273_v11  ;;  %v1328_v57 = vmax.f32 %v1320_v50, 0.0 }
 0x643   : > { %v2240_v55 = vpop.eup %2239  ;;  %v1355_v58 = vadd.f32 %v1354_v53, %v1353_v46  ;;  %v1360_v63 = vrot.slane %v1359_v51, 2  ;;  %v1341_v62 = vadd.f32 %v1340_v54, %v1332_v48  ;;  %v1346_v60 = vrot.slane %v1333_v1, 4 }
 0x644   : > { %v1322_v2 = vmul.f32 %v2240_v55, %v2727_v4  ;;  %v1336_v3 = vadd.f32 %v1328_v57, %v2689_v6  ;;  %v1329_v59 = vmax.f32 %v1321_v56, 0.0  ;;  %v1397_v6 = vld [vmem:[%s2811_s6] sm:$0xff] }
 0x645   : > { %v2242_v12 = vpop.eup %2241  ;;  %v1356_v0 = vrot.slane %v1355_v58, 1  ;;  %v1361_v5 = vadd.f32 %v1360_v63, %v1359_v51  ;;  %v1342_v7 = vrot.slane %v1341_v62, 2  ;;  %v1347_v8 = vadd.f32 %v1346_v60, %v1333_v1 }
 0x646   : > { %v1323_v9 = vmul.f32 %v2242_v12, %v2729_v13  ;;  %v1364_v61 = vrot.slane %v1336_v3, 4  ;;  %v1337_v11 = vadd.f32 %v1329_v59, %v2692_v14  ;;  %v1330_v10 = vmax.f32 %v1322_v2, 0.0 }
 0x647   : > { %v1357_v23 = vadd.f32 %v1356_v0, %v1355_v58  ;;  %v1362_v16 = vrot.slane %v1361_v5, 1  ;;  %v1343_v17 = vadd.f32 %v1342_v7, %v1341_v62  ;;  %v1348_v22 = vrot.slane %v1347_v8, 2 }
 0x648   : > { %v1365_v4 = vadd.f32 %v1364_v61, %v1336_v3  ;;  %v1370_v24 = vrot.slane %v1337_v11, 4  ;;  %v1338_v18 = vadd.f32 %v1330_v10, %v2702_v15  ;;  %v1331_v19 = vmax.f32 %v1323_v9, 0.0  ;;  %v1478_v61 = vld [vmem:[%s2812_s7] sm:$0xff] }
 0x649   : > { %v1391_v28 = vmul.f32 0.125, %v1357_v23  ;;  %v1363_v29 = vadd.f32 %v1362_v16, %v1361_v5  ;;  %v1344_v13 = vrot.slane %v1343_v17, 1  ;;  %v1349_v20 = vadd.f32 %v1348_v22, %v1347_v8 }
 0x64a   : > { %v1366_v25 = vrot.slane %v1365_v4, 2  ;;  %v1371_v14 = vadd.f32 %v1370_v24, %v1337_v11  ;;  %v1376_v26 = vrot.slane %v1338_v18, 4  ;;  %v1339_v32 = vadd.f32 %v1331_v19, %v2705_v21 }
 0x64b   : > { %v1400_v27 = vsub.f32 %v1391_v28, %v1397_v6  ;;  %v1392_v30 = vmul.f32 0.125, %v1363_v29  ;;  %v1345_v31 = vadd.f32 %v1344_v13, %v1343_v17  ;;  %v1350_v33 = vrot.slane %v1349_v20, 1 }
 0x64c   : > { %v1367_v34 = vadd.f32 %v1366_v25, %v1365_v4  ;;  %v1372_v35 = vrot.slane %v1371_v14, 2  ;;  %v1377_v36 = vadd.f32 %v1376_v26, %v1338_v18  ;;  %v1382_v37 = vrot.slane %v1339_v32, 4 }
 0x64d   : > { %v1408_v38 = vmul.f32 %v1400_v27, %v1400_v27  ;;  %v1401_v15 = vsub.f32 %v1392_v30, %v1397_v6  ;;  %v1389_v39 = vmul.f32 0.125, %v1345_v31  ;;  %v1351_v40 = vadd.f32 %v1350_v33, %v1349_v20 }
 0x64e   : > { %v1368_v41 = vrot.slane %v1367_v34, 1  ;;  %v1373_v42 = vadd.f32 %v1372_v35, %v1371_v14  ;;  %v1378_v43 = vrot.slane %v1377_v36, 2  ;;  %v1383_v44 = vadd.f32 %v1382_v37, %v1339_v32 }
 0x64f   : > { %1418 = vadd.xlane.f32.xlu0 %v1408_v38  ;;  %v1409_v45 = vmul.f32 %v1401_v15, %v1401_v15  ;;  %v1398_v46 = vsub.f32 %v1389_v39, %v1397_v6  ;;  %v1390_v21 = vmul.f32 0.125, %v1351_v40  ;;  %v2411_v11 = vmov 0.0  }
 0x650   : > { %v1369_v47 = vadd.f32 %v1368_v41, %v1367_v34  ;;  %v1374_v48 = vrot.slane %v1373_v42, 1  ;;  %v1379_v49 = vadd.f32 %v1378_v43, %v1377_v36  ;;  %v1384_v50 = vrot.slane %v1383_v44, 2  ;;  %2082 = vmatprep.subr.mxu0 %v2411_v11  ;;  %2084 = vmatprep.mubr.msk.f32.mxu0 %vm2412_vm2, %v2411_v11 }
 0x651   : > { %1420 = vadd.xlane.f32.xlu1 %v1409_v45  ;;  %v1406_v52 = vmul.f32 %v1398_v46, %v1398_v46  ;;  %v1399_v53 = vsub.f32 %v1390_v21, %v1397_v6  ;;  %2083 = vmatpush3.msra.mxu0 %v1478_v61 }
 0x652   : > { %v1393_v51 = vmul.f32 0.125, %v1369_v47  ;;  %v1375_v54 = vadd.f32 %v1374_v48, %v1373_v42  ;;  %v1380_v1 = vrot.slane %v1379_v49, 1  ;;  %v1385_v56 = vadd.f32 %v1384_v50, %v1383_v44 }
 0x653   : > { %1414 = vadd.xlane.f32.xlu0 %v1406_v52  ;;  %v1407_v57 = vmul.f32 %v1399_v53, %v1399_v53  ;;  %v1487_v44 = vlaneseq }
 0x654   : > { %v1402_v55 = vsub.f32 %v1393_v51, %v1397_v6  ;;  %v1394_v58 = vmul.f32 0.125, %v1375_v54  ;;  %v1381_v63 = vadd.f32 %v1380_v1, %v1379_v49  ;;  %v1386_v62 = vrot.slane %v1385_v56, 1 }
 0x655   : > { %1416 = vadd.xlane.f32.xlu1 %v1407_v57  ;;  %v1488_v49 = vand.u32 127, %v1487_v44  ;;  %v1490_v50 = vshrl.u32 %v1487_v44, 7 }
 0x656   : > { %v1410_v60 = vmul.f32 %v1402_v55, %v1402_v55  ;;  %v1403_v2 = vsub.f32 %v1394_v58, %v1397_v6  ;;  %v1395_v3 = vmul.f32 0.125, %v1381_v63  ;;  %v1387_v59 = vadd.f32 %v1386_v62, %v1385_v56 }
 0x657   : > { %v1491_v55 = vsub.s32 %v1488_v49, %v1490_v50 }
 0x658   : > { %1422 = vadd.xlane.f32.xlu0 %v1410_v60  ;;  %v1411_v12 = vmul.f32 %v1403_v2, %v1403_v2  ;;  %v1404_v0 = vsub.f32 %v1395_v3, %v1397_v6  ;;  %v1396_v5 = vmul.f32 0.125, %v1387_v59 }
 0x65a   : > { %1424 = vadd.xlane.f32.xlu1 %v1411_v12  ;;  %v1412_v7 = vmul.f32 %v1404_v0, %v1404_v0  ;;  %v1405_v8 = vsub.f32 %v1396_v5, %v1397_v6 }
 0x65c   : > { %1426 = vadd.xlane.f32.xlu0 %v1412_v7  ;;  %v1413_v9 = vmul.f32 %v1405_v8, %v1405_v8 }
 0x65e   : > { %1428 = vadd.xlane.f32.xlu1 %v1413_v9 }
 0x6dc   : > { %v1419_v10 = vpop.xlane.xlu0 %1418 }
 0x6dd   : > { %v1440_v23 = vadd.f32 1e-12, %v1419_v10  ;;  %v1432_v29 = vadd.f32 1.0, %v1419_v10 }
 0x6de   : > { %v1421_v16 = vpop.xlane.xlu1 %1420 }
 0x6df   : > { %2243 = vrcp.f32 %v1440_v23  ;;  %v1441_v17 = vadd.f32 1e-12, %v1421_v16  ;;  %v1433_v26 = vadd.f32 1.0, %v1421_v16 }
 0x6e0   : > { %v1415_v22 = vpop.xlane.xlu0 %1414 }
 0x6e1   : > { %2245 = vrcp.f32 %v1441_v17  ;;  %v1438_v6 = vadd.f32 1e-12, %v1415_v22  ;;  %v1430_v33 = vadd.f32 1.0, %v1415_v22 }
 0x6e2   : > { %v1417_v4 = vpop.xlane.xlu1 %1416 }
 0x6e3   : > { %2247 = vrcp.f32 %v1438_v6  ;;  %v1439_v24 = vadd.f32 1e-12, %v1417_v4  ;;  %v1431_v37 = vadd.f32 1.0, %v1417_v4 }
 0x6e5   : > { %2249 = vrcp.f32 %v1439_v24  ;;  %v1423_v18 = vpop.xlane.xlu0 %1422 }
 0x6e6   : > { %v1442_v19 = vadd.f32 1e-12, %v1423_v18  ;;  %v1434_v39 = vadd.f32 1.0, %v1423_v18 }
 0x6e7   : > { %v1425_v28 = vpop.xlane.xlu1 %1424 }
 0x6e8   : > { %2251 = vrcp.f32 %v1442_v19  ;;  %v1443_v13 = vadd.f32 1e-12, %v1425_v28  ;;  %v1435_v42 = vadd.f32 1.0, %v1425_v28 }
 0x6e9   : > { %v2244_v20 = vpop.eup %2243  ;;  %v1427_v25 = vpop.xlane.xlu0 %1426 }
 0x6ea   : > { %v1451_v14 = vmul.f32 %v2244_v20, %v1432_v29  ;;  %2253 = vrcp.f32 %v1443_v13  ;;  %v1444_v32 = vadd.f32 1e-12, %v1427_v25  ;;  %v1436_v21 = vadd.f32 1.0, %v1427_v25 }
 0x6eb   : > { %v2246_v27 = vpop.eup %2245  ;;  %v1429_v30 = vpop.xlane.xlu1 %1428 }
 0x6ec   : > { %2255 = vlog2.f32 %v1451_v14  ;;  %v1453_v31 = vmul.f32 %v2246_v27, %v1433_v26  ;;  %v1445_v34 = vadd.f32 1e-12, %v1429_v30  ;;  %v1437_v53 = vadd.f32 1.0, %v1429_v30 }
 0x6ed   : > { %v2248_v35 = vpop.eup %2247  ;;  %2257 = vrcp.f32 %v1444_v32  ;;  %v2413_v26 = vmov 1966171168  }
 0x6ee   : > { %2259 = vlog2.f32 %v1453_v31  ;;  %v1447_v36 = vmul.f32 %v2248_v35, %v1430_v33  ;;  %v1617_v32 = vunpack.c.l.s4 %v2413_v26 }
 0x6ef   : > { %v2250_v38 = vpop.eup %2249  ;;  %2261 = vrcp.f32 %v1445_v34 }
 0x6f0   : > { %2263 = vlog2.f32 %v1447_v36  ;;  %v1449_v15 = vmul.f32 %v2250_v38, %v1431_v37  ;;  %v1618_v27 = vunpack.c.0.s8 %v1617_v32 }
 0x6f2   : > { %v2252_v40 = vpop.eup %2251  ;;  %2265 = vlog2.f32 %v1449_v15  ;;  %v1621_v30 = vsub.s32 %v1618_v27, %v1490_v50 }
 0x6f3   : > { %v1455_v41 = vmul.f32 %v2252_v40, %v1434_v39 }
 0x6f4   : > { %v2254_v43 = vpop.eup %2253 }
 0x6f5   : > { %2267 = vlog2.f32 %v1455_v41  ;;  %v1457_v45 = vmul.f32 %v2254_v43, %v1435_v42 }
 0x6f6   : > { %v2256_v46 = vpop.eup %2255 }
 0x6f7   : > { %v2258_v47 = vpop.eup %2257  ;;  %2269 = vlog2.f32 %v1457_v45  ;;  %v1467_v58 = vmul.f32 0.6931472, %v2256_v46 }
 0x6f8   : > { %v2260_v48 = vpop.eup %2259  ;;  %v1459_v52 = vmul.f32 %v2258_v47, %v1436_v21 }
 0x6f9   : > { %v2262_v51 = vpop.eup %2261  ;;  %v1469_v63 = vmul.f32 0.6931472, %v2260_v48  ;;  %v1500_v59 = vrot.slane %v1467_v58, %v1491_v55 }
 0x6fa   : > { %v2264_v54 = vpop.eup %2263  ;;  %2271 = vlog2.f32 %v1459_v52  ;;  %v1461_v1 = vmul.f32 %v2262_v51, %v1437_v53 }
 0x6fb   : > { %v1463_v56 = vmul.f32 0.6931472, %v2264_v54  ;;  %v1504_v5 = vrot.slane %v1469_v63, %v1491_v55 }
 0x6fc   : > { %v2266_v57 = vpop.eup %2265  ;;  %2273 = vlog2.f32 %v1461_v1 }
 0x6fd   : > { %v1465_v62 = vmul.f32 0.6931472, %v2266_v57  ;;  %v1492_v2 = vrot.slane %v1463_v56, %v1491_v55 }
 0x6ff   : > { %v2268_v60 = vpop.eup %2267  ;;  %v1496_v3 = vrot.slane %v1465_v62, %v1491_v55 }
 0x700   : > { %v1471_v12 = vmul.f32 0.6931472, %v2268_v60 }
 0x701   : > { %v2270_v0 = vpop.eup %2269  ;;  %v1522_v7 = vsel %vm1521_vm3, %v1496_v3, %v1492_v2 }
 0x702   : > { %v1524_v8 = vsel %vm1523_vm4, %v1500_v59, %v1522_v7  ;;  %v1508_v9 = vrot.slane %v1471_v12, %v1491_v55  ;;  %v1473_v61 = vmul.f32 0.6931472, %v2270_v0 }
 0x703   : > { %v1526_v11 = vsel %vm1525_vm5, %v1504_v5, %v1524_v8 }
 0x704   : > { %v2272_v10 = vpop.eup %2271  ;;  %v1528_v23 = vsel %vm1527_vm6, %v1508_v9, %v1526_v11  ;;  %v1512_v16 = vrot.slane %v1473_v61, %v1491_v55 }
 0x705   : > { %v1475_v17 = vmul.f32 0.6931472, %v2272_v10 }
 0x706   : > { %v2274_v22 = vpop.eup %2273  ;;  %v1530_v6 = vsel %vm1529_vm7, %v1512_v16, %v1528_v23 }
 0x707   : > { %v1516_v4 = vrot.slane %v1475_v17, %v1491_v55  ;;  %v1477_v24 = vmul.f32 0.6931472, %v2274_v22 }
 0x709   : > { %v1520_v18 = vrot.slane %v1477_v24, %v1491_v55  ;;  %v1532_v19 = vsel %vm1531_vm8, %v1516_v4, %v1530_v6 }
 0x70b   : > { %v1534_v28 = vsel %vm1533_vm9, %v1520_v18, %v1532_v19 }
 0x70c   : > { %2085 = vmatmul.mubr.msk.f32.vlgmr.msra.gmra.mrb[16].mxu0 %vm1535_vm10, %v1534_v28 }
 0x7df   : > { %v1604_v29 = vpop.f32.mrb[16].mxu0 }
 0x7e0   : > { %v1861_v13 = vmul.f32 -1.442695, %v1604_v29  ;;  %v2086_v20 = vpop.f32.mrb[17].mxu0 }
 0x7e2   : > { %2275 = vpow2.f32 %v1861_v13 }
 0x7ec   : > { %v2276_v25 = vpop.eup %2275 }
 0x7ed   : > { %v1611_v14 = vadd.f32 1.0, %v2276_v25 }
 0x7ef   : > { %2277 = vrcp.f32 %v1611_v14 }
 0x7f9   : > { %v2278_v31 = vpop.eup %2277 }
 0x7fa   : > { %v1615_v33 = vcombine.high %v2278_v31, %v2278_v31  ;;  %v1622_v34 = vrot.slane %v2278_v31, %v1621_v30 }
 0x7fc   : > { %v1629_v35 = vrot.slane %v1615_v33, %v1621_v30  ;;  %v1630_v36 = vcombine.high %v1622_v34, %v1622_v34  ;;  %v1638_v37 = vrot.slane %v1622_v34, %v1621_v30  ;;  %1862 = vst.sshfl [vmem:[%s342_s23] sm:$0x1 pattern:$0x73625140] %v1622_v34 }
 0x7fe   : > { %v1631_v38 = vcombine.high %v1629_v35, %v1629_v35  ;;  %v1645_v15 = vrot.slane %v1629_v35, %v1621_v30  ;;  %v1652_v39 = vrot.slane %v1630_v36, %v1621_v30  ;;  %v1660_v40 = vcombine.high %v1638_v37, %v1638_v37  ;;  %1863 = vst.sshfl [vmem:[%s342_s23 + $0x1] sm:$0x1 pattern:$0x73625140] %v1630_v36 }
 0x7ff   : > { %1864 = vst.sshfl [vmem:[%s342_s23 + $0x4] sm:$0x1 pattern:$0x73625140] %v1629_v35 }
 0x800   : > { %v1659_v41 = vrot.slane %v1631_v38, %v1621_v30  ;;  %v1661_v42 = vcombine.high %v1645_v15, %v1645_v15  ;;  %v1662_v43 = vcombine.high %v1652_v39, %v1652_v39  ;;  %1674 = vst [vmem:[%s342_s23 + $0x2] sm:$0x1] %v1660_v40  ;;  %1865 = vst.sshfl [vmem:[%s342_s23 + $0x5] sm:$0x1 pattern:$0x73625140] %v1631_v38 }
 0x802   : > { %v1663_v44 = vcombine.high %v1659_v41, %v1659_v41  ;;  %1675 = vst [vmem:[%s342_s23 + $0x3] sm:$0x1] %v1662_v43  ;;  %1678 = vst [vmem:[%s342_s23 + $0x6] sm:$0x1] %v1661_v42 }
 0x804   : > { %1679 = vst [vmem:[%s342_s23 + $0x7] sm:$0x1] %v1663_v44 }
 0x805   : > { %2348 = shalt.err (!%p2345_p13)
}
 0x806   : > { %s2349_s18 = scalar_lea.hbm %s2758_s17, 128  ;;  %s2353_s23 = scalar_lea.hbm %s2813_s8, 256 }
 0x807   : > { %p2350_p0 = scmp.ne.s32.totalorder %s2758_s17, %s2349_s18  ;;  %p2354_p9 = scmp.lt.u32.totalorder %s2758_s17, %s2813_s8 }
 0x808   : > { %p2355_p10 = scmp.lt.u32.totalorder %s2353_s23, %s2349_s18  ;;  %p2357_p1 = scmp.lt.u32.totalorder %s2349_s18, %s2758_s17 }
 0x809   : > { %p2351_p6 = pnand %p2350_p0, %p2826_p2 }
 0x80a   : > { %p2356_p12 = por %p2355_p10, %p2354_p9 }
 0x80b   : > { %p2352_p5 = pneg %p2351_p6 }
 0x80c   : > { %p2358_p3 = por %p2357_p1, %p2356_p12 }
 0x80e   : > { %p2359_p4 = pnand %p2358_p3, %p2352_p5 }
 0x810   : > { %2362 = shalt.err (!%p2359_p4)
}
 0x811   : > { %s2415_s22 = smov 16   ;;  %s2416_s21 = smov 1  }
 0x812   : > { %2111 = dma.vmem_to_hbm [thread:$0]  (%p2826_p2), %s2760_s25, 128, %s2758_s17, %s2764_s9, %s2415_s22, %s2415_s22, %s2416_s21  }
 0x813 PF: > { %p2128_p7 = scmp.ge.s32.totalorder %s2405_s30, 2  ;;  %s1709_s10 = sand.u32 1, %s2393_s27  }
 0x814   : > { %p2827_p8 = scmp.ne.s32.totalorder %s2818_s16, 0  ;;  %s1710_s12 = scalar_lea.sflag [#allocation4], %s1709_s10 }
 0x816   : > { %p2121_p11 = pnand %p2128_p7, %p2827_p8 }
 0x818   : > { %2388 = dma.done.wait (!%p2121_p11), %s1710_s12, 128  }
 0x819   : > { %2390 = vsyncadd (!%p2121_p11), %s1710_s12, 4294967168  ;;  %p20_p13 = scmp.ge.s32.totalorder %s2487_s11, 4   ;;  %s2828_s27 = smov %s2397_s28 }
 0x81a   : > { %s2829_s28 = smov %s2401_s29  ;;  %s2830_s29 = smov %s2498_s14 }
 0x81b   : > { %s2831_s30 = smov %s2487_s11  ;;  %22 = sbr.rel (!%p20_p13) target bundleno = 5 (0x5), region = 101 }
 0x822   :  { %1715 = vsyncpa [#allocation3], 1 }
 0x823   :  { %1717 = vsyncpa [#allocation3 + $0x1], 1 }
 0x824   :  { %1718 = vsyncpa [#allocation6], 1 }
 0x825   :  { %1719 = vsyncpa [#allocation4], 1 }
 0x826   :  { %1721 = vsyncpa [#allocation4 + $0x1], 1 }

</bundles_post_ra>
